<compile_context>
chip_gen: v7x
topology: tpu7x:2x2x1
jax: 0.10.0
libtpu: 0.0.40
codegen_flags: <defaults>
</compile_context>

<pallas_src>
import functools
import math

import jax
import jax.numpy as jnp
from jax.experimental import pallas as pl
from jax.experimental.pallas import tpu as pltpu


def _layernorm(h, gamma, beta, eps=1e-5):
    mu = jnp.mean(h, axis=-1, keepdims=True)
    var = jnp.mean((h - mu) ** 2, axis=-1, keepdims=True)
    return (h - mu) * jax.lax.rsqrt(var + eps) * gamma + beta


# ----------------------------- Pallas kernel ------------------------------- #

def encoder_stack_kernel(x_ref,
                         wq_ref, wk_ref, wv_ref, wo_ref, w1_ref, w2_ref,
                         vd_ref, vff_ref, vfin_ref,
                         o_ref,
                         acc_ref, *, num_heads, bt, seq):
    l = pl.program_id(1)
    n_layers = pl.num_programs(1)

    # Load this batch tile's activations into the layer-resident f32 scratch.
    @pl.when(l == 0)
    def _():
        acc_ref[...] = x_ref[...].reshape(bt * seq, x_ref.shape[-1]).astype(jnp.float32)

    x = acc_ref[...]                               # (M, D) f32, M = Bt * S
    M, D = x.shape
    dh = D // num_heads

    # Packed per-layer vectors: rows = [bq, bk, bv, bo, g1, b1n, g2, b2n, bf2].
    vd = vd_ref[0]                                 # (9, D) f32
    bq, bk, bv, bo = vd[0:1], vd[1:2], vd[2:3], vd[3:4]
    g1, b1n, g2, b2n, bf2 = vd[4:5], vd[5:6], vd[6:7], vd[7:8], vd[8:9]
    bf1 = vff_ref[0]                               # (1, FF) f32

    # --- sublayer 1: x + MHSA(LayerNorm(x)) ---
    xn = _layernorm(x, g1, b1n)
    xb = xn.astype(jnp.bfloat16)
    # NOTE: wq / bq already pre-scaled by 1/sqrt(dh) in the wrapper.
    # Single bf16 cast of q/k/v right after the bias add (not per head).
    q = (jnp.dot(xb, wq_ref[0], preferred_element_type=jnp.float32) + bq).astype(jnp.bfloat16)
    k = (jnp.dot(xb, wk_ref[0], preferred_element_type=jnp.float32) + bk).astype(jnp.bfloat16)
    v = (jnp.dot(xb, wv_ref[0], preferred_element_type=jnp.float32) + bv).astype(jnp.bfloat16)

    q3 = q.reshape(bt, seq, D)
    k3 = k.reshape(bt, seq, D)
    v3 = v.reshape(bt, seq, D)
    wo = wo_ref[0]                                 # (D, D) bf16

    proj = jnp.zeros((M, D), jnp.float32)          # lane-dense accumulator
    for h in range(num_heads):                     # static unrolled head loop
        sl = slice(h * dh, (h + 1) * dh)
        qh, kh, vh = q3[:, :, sl], k3[:, :, sl], v3[:, :, sl]
        # Batched QK^T contracting the last dim of both operands (no transpose).
        s = jnp.einsum('bqd,bkd->bqk', qh, kh,
                       preferred_element_type=jnp.float32)     # (Bt, S, S)
        s = s - jnp.max(s, axis=-1, keepdims=True)
        p = jnp.exp(s)
        p = p * pl.reciprocal(jnp.sum(p, axis=-1, keepdims=True), approx=True)
        oh = jnp.einsum('bqk,bkd->bqd', p.astype(jnp.bfloat16), vh,
                        preferred_element_type=jnp.float32)    # (Bt, S, dh)
        # Fold output projection into the head loop: dense (M, D) accumulate,
        # no lane-masked per-head column stores, no attn scratch.
        proj = proj + jnp.dot(oh.reshape(M, dh).astype(jnp.bfloat16), wo[sl, :],
                              preferred_element_type=jnp.float32)
    x = x + proj + bo                              # dropout == identity (eval)

    # --- sublayer 2: x + FFN(LayerNorm(x)) ---
    xn2 = _layernorm(x, g2, b2n).astype(jnp.bfloat16)
    hdn = jnp.dot(xn2, w1_ref[0], preferred_element_type=jnp.float32) + bf1
    hdn = jnp.maximum(hdn, 0.0).astype(jnp.bfloat16)
    ff = jnp.dot(hdn, w2_ref[0], preferred_element_type=jnp.float32) + bf2
    x = x + ff

    acc_ref[...] = x                               # carry to the next layer

    # Fused final encoder LayerNorm; single HBM writeback per batch tile.
    @pl.when(l == n_layers - 1)
    def _():
        gf, bfin = vfin_ref[0, 0:1], vfin_ref[0, 1:2]
        y = _layernorm(x, gf, bfin).astype(o_ref.dtype)
        o_ref[...] = y.reshape(bt, seq, D)


# ------------------------------ JAX wrapper -------------------------------- #

def _pick_batch_tile(B, S, target_rows=256, max_rows=1024):
    """Largest divisor Bt of B with Bt*S <= max_rows, preferring Bt*S >= target."""
    best = 1
    for bt in range(1, B + 1):
        if B % bt:
            continue
        if bt * S > max_rows:
            break
        best = bt
        if bt * S >= target_rows:
            break
    return best


def _vmem_budget_bytes(Bt, S, D, FF):
    wbytes = (4 * D * D + 2 * D * FF) * 2          # bf16 weights, one layer
    vbytes = (9 * D + FF + 2 * D) * 4              # packed vectors
    per_layer = (wbytes + vbytes) * 2              # double-buffered over l
    act = Bt * S * D * 4 * 4                       # in/out blocks + acc scratch
    tmp = Bt * S * max(D, FF) * 4 * 6              # kernel temporaries (rough)
    est = 2 * (per_layer + act + tmp)              # 2x headroom
    return int(min(max(est, 16 * 1024 * 1024), 48 * 1024 * 1024))


def encoder_forward(x, params):
    """Pallas implementation of Encoder.forward (mask=None, eval mode)."""
    B, S, D = x.shape
    H = params["num_heads"]
    layers = params["layers"]
    L = len(layers)
    dh = D // H
    FF = layers[0]["w1"].shape[-1]
    scale = 1.0 / math.sqrt(dh)
    Bt = _pick_batch_tile(B, S)

    bf16 = jnp.bfloat16

    def stack(name):
        return jnp.stack([lp[name] for lp in layers], axis=0)

    # Matmul weights stored bf16 (MXU operands, half the weight DMA bytes).
    # 1/sqrt(dh) folded into the query projection (free in-kernel).
    wq = (stack("wq") * scale).astype(bf16)        # (L, D, D)
    wk = stack("wk").astype(bf16)
    wv = stack("wv").astype(bf16)
    wo = stack("wo").astype(bf16)
    w1 = stack("w1").astype(bf16)                  # (L, D, FF)
    w2 = stack("w2").astype(bf16)                  # (L, FF, D)

    # Pack the nine per-layer D-sized vectors into one (L, 9, D) array and the
    # FF-sized bias into (L, 1, FF): two DMA descriptors instead of ten.
    vd = jnp.stack([jnp.concatenate(
        [lp["bq"] * scale, lp["bk"], lp["bv"], lp["bo"],
         lp["g1"], lp["b1n"], lp["g2"], lp["b2n"], lp["bf2"]], axis=0)
        for lp in layers], axis=0)                 # (L, 9, D) f32
    vff = stack("bf1")                             # (L, 1, FF) f32
    vfin = jnp.concatenate([params["gf"], params["bf"]], axis=0)[None]  # (1, 2, D)

    xspec = pl.BlockSpec((Bt, S, D), lambda b, l: (b, 0, 0))

    def lspec(a):   # per-layer (leading L axis) parameter
        return pl.BlockSpec((1,) + tuple(a.shape[1:]), lambda b, l: (l, 0, 0))

    finspec = pl.BlockSpec(tuple(vfin.shape), lambda b, l: (0, 0, 0))

    args = (x, wq, wk, wv, wo, w1, w2, vd, vff, vfin)
    in_specs = ([xspec]
                + [lspec(a) for a in (wq, wk, wv, wo, w1, w2, vd, vff)]
                + [finspec])

    return pl.pallas_call(
        functools.partial(encoder_stack_kernel, num_heads=H, bt=Bt, seq=S),
        out_shape=jax.ShapeDtypeStruct((B, S, D), x.dtype),
        grid=(B // Bt, L),                         # l innermost: layer carry
        in_specs=in_specs,
        out_specs=xspec,
        scratch_shapes=[pltpu.VMEM((Bt * S, D), jnp.float32)],  # resident acts
        compiler_params=pltpu.CompilerParams(
            dimension_semantics=("parallel", "arbitrary"),
            vmem_limit_bytes=_vmem_budget_bytes(Bt, S, D, FF)),
    )(*args)


# ------------------------- Pure-JAX f32 reference -------------------------- #

def encoder_forward_ref(x, params):
    """Mirrors the PyTorch module (pre-norm sublayers, eval mode), f32."""
    num_heads = params["num_heads"]
    B, S, D = x.shape
    dh = D // num_heads
    scale = 1.0 / math.sqrt(dh)
    for lp in params["layers"]:
        xn = _layernorm(x, lp["g1"][0], lp["b1n"][0])
        q = xn @ lp["wq"] + lp["bq"][0]
        k = xn @ lp["wk"] + lp["bk"][0]
        v = xn @ lp["wv"] + lp["bv"][0]
        q = q.reshape(B, S, num_heads, dh).transpose(0, 2, 1, 3)
        k = k.reshape(B, S, num_heads, dh).transpose(0, 2, 1, 3)
        v = v.reshape(B, S, num_heads, dh).transpose(0, 2, 1, 3)
        s = jnp.einsum("bhqd,bhkd->bhqk", q, k) * scale
        p = jax.nn.softmax(s, axis=-1)
        o = jnp.einsum("bhqk,bhkd->bhqd", p, v)
        o = o.transpose(0, 2, 1, 3).reshape(B, S, D)
        x = x + (o @ lp["wo"] + lp["bo"][0])
        xn2 = _layernorm(x, lp["g2"][0], lp["b2n"][0])
        x = x + (jnp.maximum(xn2 @ lp["w1"] + lp["bf1"][0], 0.0) @ lp["w2"] + lp["bf2"][0])
    return _layernorm(x, params["gf"][0], params["bf"][0])


def init_params(key, num_layers, d_model, num_heads, d_ff):
    layers = []
    for l in range(num_layers):
        ks = jax.random.split(jax.random.fold_in(key, l), 6)
        layers.append(dict(
            wq=0.05 * jax.random.normal(ks[0], (d_model, d_model), jnp.float32),
            bq=jnp.zeros((1, d_model), jnp.float32),
            wk=0.05 * jax.random.normal(ks[1], (d_model, d_model), jnp.float32),
            bk=jnp.zeros((1, d_model), jnp.float32),
            wv=0.05 * jax.random.normal(ks[2], (d_model, d_model), jnp.float32),
            bv=jnp.zeros((1, d_model), jnp.float32),
            wo=0.05 * jax.random.normal(ks[3], (d_model, d_model), jnp.float32),
            bo=jnp.zeros((1, d_model), jnp.float32),
            g1=jnp.ones((1, d_model), jnp.float32),
            b1n=jnp.zeros((1, d_model), jnp.float32),
            g2=jnp.ones((1, d_model), jnp.float32),
            b2n=jnp.zeros((1, d_model), jnp.float32),
            w1=0.05 * jax.random.normal(ks[4], (d_model, d_ff), jnp.float32),
            bf1=jnp.zeros((1, d_ff), jnp.float32),
            w2=0.05 * jax.random.normal(ks[5], (d_ff, d_model), jnp.float32),
            bf2=jnp.zeros((1, d_model), jnp.float32),
        ))
    return dict(layers=layers,
                num_heads=num_heads,
                gf=jnp.ones((1, d_model), jnp.float32),
                bf=jnp.zeros((1, d_model), jnp.float32))


if __name__ == "__main__":
    # NOTE: tiny correctness-check shape; benchmark at D >= 128, dh >= 64.
    B, S, D, H, FF, L = 2, 8, 32, 4, 64, 2
    key = jax.random.PRNGKey(0)
    kx, kp = jax.random.split(key)
    x = jax.random.normal(kx, (B, S, D), jnp.float32)
    params = init_params(kp, L, D, H, FF)

    out = encoder_forward(x, params)
    out = jax.block_until_ready(out)

    ref = encoder_forward_ref(x, params)
    assert out.shape == (B, S, D)
    # Kernel uses bf16 MXU operands + approx reciprocal -> slightly looser tol.
    assert jnp.allclose(out, ref, atol=2e-2, rtol=2e-2)
    print("KERNEL_OK")
</pallas_src>

<mosaic_0001>
module attributes {stable_mosaic.version = 11 : i64} {
  func.func @encoder_stack_kernel(%arg0: i32, %arg1: i32, %arg2: memref<2x8x32xf32, #tpu.memory_space<vmem>>, %arg3: memref<1x32x32xbf16, #tpu.memory_space<vmem>>, %arg4: memref<1x32x32xbf16, #tpu.memory_space<vmem>>, %arg5: memref<1x32x32xbf16, #tpu.memory_space<vmem>>, %arg6: memref<1x32x32xbf16, #tpu.memory_space<vmem>>, %arg7: memref<1x32x64xbf16, #tpu.memory_space<vmem>>, %arg8: memref<1x64x32xbf16, #tpu.memory_space<vmem>>, %arg9: memref<1x9x32xf32, #tpu.memory_space<vmem>>, %arg10: memref<1x1x64xf32, #tpu.memory_space<vmem>>, %arg11: memref<1x2x32xf32, #tpu.memory_space<vmem>>, %arg12: memref<2x8x32xf32, #tpu.memory_space<vmem>>, %arg13: memref<16x32xf32, #tpu.memory_space<vmem>>) attributes {dimension_semantics = [#tpu.dimension_semantics<parallel>, #tpu.dimension_semantics<arbitrary>], iteration_bounds = array<i64: 1, 2>, scalar_prefetch = 0 : i64, scratch_operands = 1 : i64, tpu.core_type = #tpu.core_type<tc>, window_params = [{transform_indices = @transform_0, window_bounds = array<i64: 2, 8, 32>}, {transform_indices = @transform_1, window_bounds = array<i64: 1, 32, 32>}, {transform_indices = @transform_2, window_bounds = array<i64: 1, 32, 32>}, {transform_indices = @transform_3, window_bounds = array<i64: 1, 32, 32>}, {transform_indices = @transform_4, window_bounds = array<i64: 1, 32, 32>}, {transform_indices = @transform_5, window_bounds = array<i64: 1, 32, 64>}, {transform_indices = @transform_6, window_bounds = array<i64: 1, 64, 32>}, {transform_indices = @transform_7, window_bounds = array<i64: 1, 9, 32>}, {transform_indices = @transform_8, window_bounds = array<i64: 1, 1, 64>}, {pipeline_mode = #tpu.pipeline_mode<synchronous>, transform_indices = @transform_9, window_bounds = array<i64: 1, 2, 32>}, {transform_indices = @transform_10, window_bounds = array<i64: 2, 8, 32>}]} {
    %c0_i32 = arith.constant 0 : i32
    %0 = arith.cmpi eq, %arg1, %c0_i32 : i32
    %1 = arith.extui %0 : i1 to i32
    %c0_i32_0 = arith.constant 0 : i32
    %2 = arith.cmpi ne, %1, %c0_i32_0 : i32
    scf.if %2 {
      %c0_65 = arith.constant 0 : index
      %c0_66 = arith.constant 0 : index
      %c0_67 = arith.constant 0 : index
      %192 = vector.load %arg2[%c0_65, %c0_66, %c0_67] : memref<2x8x32xf32, #tpu.memory_space<vmem>>, vector<2x8x32xf32>
      %193 = vector.shape_cast %192 : vector<2x8x32xf32> to vector<16x32xf32>
      %c0_68 = arith.constant 0 : index
      %c0_69 = arith.constant 0 : index
      %194 = vector.load %arg13[%c0_68, %c0_69] : memref<16x32xf32, #tpu.memory_space<vmem>>, vector<16x32xf32>
      tpu.vector_store %arg13[%c0_68, %c0_69], %193 {strides = array<i32>} : memref<16x32xf32, #tpu.memory_space<vmem>>, vector<16x32xf32>,
    } else {
    }
    %c0 = arith.constant 0 : index
    %c0_1 = arith.constant 0 : index
    %3 = vector.load %arg13[%c0, %c0_1] : memref<16x32xf32, #tpu.memory_space<vmem>>, vector<16x32xf32>
    %c0_2 = arith.constant 0 : index
    %c0_3 = arith.constant 0 : index
    %c0_4 = arith.constant 0 : index
    %4 = vector.load %arg9[%c0_2, %c0_3, %c0_4] : memref<1x9x32xf32, #tpu.memory_space<vmem>>, vector<1x9x32xf32>
    %5 = vector.shape_cast %4 : vector<1x9x32xf32> to vector<9x32xf32>
    %6 = vector.extract_strided_slice %5 {offsets = [0, 0], sizes = [1, 32], strides = [1, 1]} : vector<9x32xf32> to vector<1x32xf32>
    %7 = vector.extract_strided_slice %5 {offsets = [1, 0], sizes = [1, 32], strides = [1, 1]} : vector<9x32xf32> to vector<1x32xf32>
    %8 = vector.extract_strided_slice %5 {offsets = [2, 0], sizes = [1, 32], strides = [1, 1]} : vector<9x32xf32> to vector<1x32xf32>
    %9 = vector.extract_strided_slice %5 {offsets = [3, 0], sizes = [1, 32], strides = [1, 1]} : vector<9x32xf32> to vector<1x32xf32>
    %10 = vector.extract_strided_slice %5 {offsets = [4, 0], sizes = [1, 32], strides = [1, 1]} : vector<9x32xf32> to vector<1x32xf32>
    %11 = vector.extract_strided_slice %5 {offsets = [5, 0], sizes = [1, 32], strides = [1, 1]} : vector<9x32xf32> to vector<1x32xf32>
    %12 = vector.extract_strided_slice %5 {offsets = [6, 0], sizes = [1, 32], strides = [1, 1]} : vector<9x32xf32> to vector<1x32xf32>
    %13 = vector.extract_strided_slice %5 {offsets = [7, 0], sizes = [1, 32], strides = [1, 1]} : vector<9x32xf32> to vector<1x32xf32>
    %14 = vector.extract_strided_slice %5 {offsets = [8, 0], sizes = [1, 32], strides = [1, 1]} : vector<9x32xf32> to vector<1x32xf32>
    %c0_5 = arith.constant 0 : index
    %c0_6 = arith.constant 0 : index
    %c0_7 = arith.constant 0 : index
    %15 = vector.load %arg10[%c0_5, %c0_6, %c0_7] : memref<1x1x64xf32, #tpu.memory_space<vmem>>, vector<1x1x64xf32>
    %16 = vector.shape_cast %15 : vector<1x1x64xf32> to vector<1x64xf32>
    %cst = arith.constant dense<0.000000e+00> : vector<16xf32>
    %17 = vector.multi_reduction <add>, %3, %cst [1] : vector<16x32xf32> to vector<16xf32>
    %18 = vector.shape_cast %17 : vector<16xf32> to vector<16x1xf32>
    %cst_8 = arith.constant 3.200000e+01 : f32
    %19 = vector.broadcast %cst_8 : f32 to vector<16x1xf32>
    %20 = arith.divf %18, %19 : vector<16x1xf32>
    %21 = vector.broadcast %20 : vector<16x1xf32> to vector<16x32xf32>
    %22 = arith.subf %3, %21 : vector<16x32xf32>
    %23 = arith.mulf %22, %22 : vector<16x32xf32>
    %cst_9 = arith.constant dense<0.000000e+00> : vector<16xf32>
    %24 = vector.multi_reduction <add>, %23, %cst_9 [1] : vector<16x32xf32> to vector<16xf32>
    %25 = vector.shape_cast %24 : vector<16xf32> to vector<16x1xf32>
    %cst_10 = arith.constant 3.200000e+01 : f32
    %26 = vector.broadcast %cst_10 : f32 to vector<16x1xf32>
    %27 = arith.divf %25, %26 : vector<16x1xf32>
    %28 = vector.broadcast %20 : vector<16x1xf32> to vector<16x32xf32>
    %29 = arith.subf %3, %28 : vector<16x32xf32>
    %cst_11 = arith.constant 9.99999974E-6 : f32
    %30 = vector.broadcast %cst_11 : f32 to vector<16x1xf32>
    %31 = arith.addf %27, %30 : vector<16x1xf32>
    %32 = math.rsqrt %31 : vector<16x1xf32>
    %33 = vector.broadcast %32 : vector<16x1xf32> to vector<16x32xf32>
    %34 = arith.mulf %29, %33 : vector<16x32xf32>
    %35 = vector.broadcast %10 : vector<1x32xf32> to vector<16x32xf32>
    %36 = arith.mulf %34, %35 : vector<16x32xf32>
    %37 = vector.broadcast %11 : vector<1x32xf32> to vector<16x32xf32>
    %38 = arith.addf %36, %37 : vector<16x32xf32>
    %39 = arith.truncf %38 : vector<16x32xf32> to vector<16x32xbf16>
    %c0_12 = arith.constant 0 : index
    %c0_13 = arith.constant 0 : index
    %c0_14 = arith.constant 0 : index
    %40 = vector.load %arg3[%c0_12, %c0_13, %c0_14] : memref<1x32x32xbf16, #tpu.memory_space<vmem>>, vector<1x32x32xbf16>
    %41 = vector.shape_cast %40 : vector<1x32x32xbf16> to vector<32x32xbf16>
    %cst_15 = arith.constant dense<0.000000e+00> : vector<16x32xf32>
    %42 = tpu.matmul %39, %41, %cst_15 {dimension_numbers = #tpu.dot_dimension_numbers<[1], [0], [0], [1], [0, 0, 1, 1], [], []>} : vector<16x32xbf16>, vector<32x32xbf16>, vector<16x32xf32> -> vector<16x32xf32>
    %43 = vector.broadcast %6 : vector<1x32xf32> to vector<16x32xf32>
    %44 = arith.addf %42, %43 : vector<16x32xf32>
    %45 = arith.truncf %44 : vector<16x32xf32> to vector<16x32xbf16>
    %c0_16 = arith.constant 0 : index
    %c0_17 = arith.constant 0 : index
    %c0_18 = arith.constant 0 : index
    %46 = vector.load %arg4[%c0_16, %c0_17, %c0_18] : memref<1x32x32xbf16, #tpu.memory_space<vmem>>, vector<1x32x32xbf16>
    %47 = vector.shape_cast %46 : vector<1x32x32xbf16> to vector<32x32xbf16>
    %cst_19 = arith.constant dense<0.000000e+00> : vector<16x32xf32>
    %48 = tpu.matmul %39, %47, %cst_19 {dimension_numbers = #tpu.dot_dimension_numbers<[1], [0], [0], [1], [0, 0, 1, 1], [], []>} : vector<16x32xbf16>, vector<32x32xbf16>, vector<16x32xf32> -> vector<16x32xf32>
    %49 = vector.broadcast %7 : vector<1x32xf32> to vector<16x32xf32>
    %50 = arith.addf %48, %49 : vector<16x32xf32>
    %51 = arith.truncf %50 : vector<16x32xf32> to vector<16x32xbf16>
    %c0_20 = arith.constant 0 : index
    %c0_21 = arith.constant 0 : index
    %c0_22 = arith.constant 0 : index
    %52 = vector.load %arg5[%c0_20, %c0_21, %c0_22] : memref<1x32x32xbf16, #tpu.memory_space<vmem>>, vector<1x32x32xbf16>
    %53 = vector.shape_cast %52 : vector<1x32x32xbf16> to vector<32x32xbf16>
    %cst_23 = arith.constant dense<0.000000e+00> : vector<16x32xf32>
    %54 = tpu.matmul %39, %53, %cst_23 {dimension_numbers = #tpu.dot_dimension_numbers<[1], [0], [0], [1], [0, 0, 1, 1], [], []>} : vector<16x32xbf16>, vector<32x32xbf16>, vector<16x32xf32> -> vector<16x32xf32>
    %55 = vector.broadcast %8 : vector<1x32xf32> to vector<16x32xf32>
    %56 = arith.addf %54, %55 : vector<16x32xf32>
    %57 = arith.truncf %56 : vector<16x32xf32> to vector<16x32xbf16>
    %58 = vector.shape_cast %45 : vector<16x32xbf16> to vector<2x8x32xbf16>
    %59 = vector.shape_cast %51 : vector<16x32xbf16> to vector<2x8x32xbf16>
    %60 = vector.shape_cast %57 : vector<16x32xbf16> to vector<2x8x32xbf16>
    %c0_24 = arith.constant 0 : index
    %c0_25 = arith.constant 0 : index
    %c0_26 = arith.constant 0 : index
    %61 = vector.load %arg6[%c0_24, %c0_25, %c0_26] : memref<1x32x32xbf16, #tpu.memory_space<vmem>>, vector<1x32x32xbf16>
    %62 = vector.shape_cast %61 : vector<1x32x32xbf16> to vector<32x32xbf16>
    %cst_27 = arith.constant 0.000000e+00 : f32
    %63 = vector.broadcast %cst_27 : f32 to vector<16x32xf32>
    %64 = vector.extract_strided_slice %58 {offsets = [0, 0, 0], sizes = [2, 8, 8], strides = [1, 1, 1]} : vector<2x8x32xbf16> to vector<2x8x8xbf16>
    %65 = vector.extract_strided_slice %59 {offsets = [0, 0, 0], sizes = [2, 8, 8], strides = [1, 1, 1]} : vector<2x8x32xbf16> to vector<2x8x8xbf16>
    %66 = vector.extract_strided_slice %60 {offsets = [0, 0, 0], sizes = [2, 8, 8], strides = [1, 1, 1]} : vector<2x8x32xbf16> to vector<2x8x8xbf16>
    "tpu.trace_start"() <{level = 10 : i32, message = "bqd,bkd->bqk"}> : () -> ()
    %cst_28 = arith.constant dense<0.000000e+00> : vector<2x8x8xf32>
    %67 = tpu.matmul %64, %65, %cst_28 {dimension_numbers = #tpu.dot_dimension_numbers<[2], [2], [1], [1], [0, 0, 0, 1, 1, 1], [0], [0]>} : vector<2x8x8xbf16>, vector<2x8x8xbf16>, vector<2x8x8xf32> -> vector<2x8x8xf32>
    "tpu.trace_stop"() : () -> ()
    %cst_29 = arith.constant dense<0xFF800000> : vector<2x8xf32>
    %68 = vector.multi_reduction <maximumf>, %67, %cst_29 [2] : vector<2x8x8xf32> to vector<2x8xf32>
    %69 = vector.shape_cast %68 : vector<2x8xf32> to vector<2x8x1xf32>
    %70 = vector.broadcast %69 : vector<2x8x1xf32> to vector<2x8x8xf32>
    %71 = arith.subf %67, %70 : vector<2x8x8xf32>
    %72 = math.exp %71 : vector<2x8x8xf32>
    %cst_30 = arith.constant dense<0.000000e+00> : vector<2x8xf32>
    %73 = vector.multi_reduction <add>, %72, %cst_30 [2] : vector<2x8x8xf32> to vector<2x8xf32>
    %74 = vector.shape_cast %73 : vector<2x8xf32> to vector<2x8x1xf32>
    %75 = tpu.reciprocal %74 {approx = true} : vector<2x8x1xf32> -> vector<2x8x1xf32>
    %76 = vector.broadcast %75 : vector<2x8x1xf32> to vector<2x8x8xf32>
    %77 = arith.mulf %72, %76 : vector<2x8x8xf32>
    %78 = arith.truncf %77 : vector<2x8x8xf32> to vector<2x8x8xbf16>
    "tpu.trace_start"() <{level = 10 : i32, message = "bqk,bkd->bqd"}> : () -> ()
    %cst_31 = arith.constant dense<0.000000e+00> : vector<2x8x8xf32>
    %79 = tpu.matmul %78, %66, %cst_31 {dimension_numbers = #tpu.dot_dimension_numbers<[2], [1], [1], [2], [0, 0, 0, 1, 1, 2], [0], [0]>} : vector<2x8x8xbf16>, vector<2x8x8xbf16>, vector<2x8x8xf32> -> vector<2x8x8xf32>
    "tpu.trace_stop"() : () -> ()
    %80 = vector.shape_cast %79 : vector<2x8x8xf32> to vector<16x8xf32>
    %81 = arith.truncf %80 : vector<16x8xf32> to vector<16x8xbf16>
    %82 = vector.extract_strided_slice %62 {offsets = [0, 0], sizes = [8, 32], strides = [1, 1]} : vector<32x32xbf16> to vector<8x32xbf16>
    %cst_32 = arith.constant dense<0.000000e+00> : vector<16x32xf32>
    %83 = tpu.matmul %81, %82, %cst_32 {dimension_numbers = #tpu.dot_dimension_numbers<[1], [0], [0], [1], [0, 0, 1, 1], [], []>} : vector<16x8xbf16>, vector<8x32xbf16>, vector<16x32xf32> -> vector<16x32xf32>
    %84 = arith.addf %63, %83 : vector<16x32xf32>
    %85 = vector.extract_strided_slice %58 {offsets = [0, 0, 8], sizes = [2, 8, 8], strides = [1, 1, 1]} : vector<2x8x32xbf16> to vector<2x8x8xbf16>
    %86 = vector.extract_strided_slice %59 {offsets = [0, 0, 8], sizes = [2, 8, 8], strides = [1, 1, 1]} : vector<2x8x32xbf16> to vector<2x8x8xbf16>
    %87 = vector.extract_strided_slice %60 {offsets = [0, 0, 8], sizes = [2, 8, 8], strides = [1, 1, 1]} : vector<2x8x32xbf16> to vector<2x8x8xbf16>
    "tpu.trace_start"() <{level = 10 : i32, message = "bqd,bkd->bqk"}> : () -> ()
    %cst_33 = arith.constant dense<0.000000e+00> : vector<2x8x8xf32>
    %88 = tpu.matmul %85, %86, %cst_33 {dimension_numbers = #tpu.dot_dimension_numbers<[2], [2], [1], [1], [0, 0, 0, 1, 1, 1], [0], [0]>} : vector<2x8x8xbf16>, vector<2x8x8xbf16>, vector<2x8x8xf32> -> vector<2x8x8xf32>
    "tpu.trace_stop"() : () -> ()
    %cst_34 = arith.constant dense<0xFF800000> : vector<2x8xf32>
    %89 = vector.multi_reduction <maximumf>, %88, %cst_34 [2] : vector<2x8x8xf32> to vector<2x8xf32>
    %90 = vector.shape_cast %89 : vector<2x8xf32> to vector<2x8x1xf32>
    %91 = vector.broadcast %90 : vector<2x8x1xf32> to vector<2x8x8xf32>
    %92 = arith.subf %88, %91 : vector<2x8x8xf32>
    %93 = math.exp %92 : vector<2x8x8xf32>
    %cst_35 = arith.constant dense<0.000000e+00> : vector<2x8xf32>
    %94 = vector.multi_reduction <add>, %93, %cst_35 [2] : vector<2x8x8xf32> to vector<2x8xf32>
    %95 = vector.shape_cast %94 : vector<2x8xf32> to vector<2x8x1xf32>
    %96 = tpu.reciprocal %95 {approx = true} : vector<2x8x1xf32> -> vector<2x8x1xf32>
    %97 = vector.broadcast %96 : vector<2x8x1xf32> to vector<2x8x8xf32>
    %98 = arith.mulf %93, %97 : vector<2x8x8xf32>
    %99 = arith.truncf %98 : vector<2x8x8xf32> to vector<2x8x8xbf16>
    "tpu.trace_start"() <{level = 10 : i32, message = "bqk,bkd->bqd"}> : () -> ()
    %cst_36 = arith.constant dense<0.000000e+00> : vector<2x8x8xf32>
    %100 = tpu.matmul %99, %87, %cst_36 {dimension_numbers = #tpu.dot_dimension_numbers<[2], [1], [1], [2], [0, 0, 0, 1, 1, 2], [0], [0]>} : vector<2x8x8xbf16>, vector<2x8x8xbf16>, vector<2x8x8xf32> -> vector<2x8x8xf32>
    "tpu.trace_stop"() : () -> ()
    %101 = vector.shape_cast %100 : vector<2x8x8xf32> to vector<16x8xf32>
    %102 = arith.truncf %101 : vector<16x8xf32> to vector<16x8xbf16>
    %103 = vector.extract_strided_slice %62 {offsets = [8, 0], sizes = [8, 32], strides = [1, 1]} : vector<32x32xbf16> to vector<8x32xbf16>
    %cst_37 = arith.constant dense<0.000000e+00> : vector<16x32xf32>
    %104 = tpu.matmul %102, %103, %cst_37 {dimension_numbers = #tpu.dot_dimension_numbers<[1], [0], [0], [1], [0, 0, 1, 1], [], []>} : vector<16x8xbf16>, vector<8x32xbf16>, vector<16x32xf32> -> vector<16x32xf32>
    %105 = arith.addf %84, %104 : vector<16x32xf32>
    %106 = vector.extract_strided_slice %58 {offsets = [0, 0, 16], sizes = [2, 8, 8], strides = [1, 1, 1]} : vector<2x8x32xbf16> to vector<2x8x8xbf16>
    %107 = vector.extract_strided_slice %59 {offsets = [0, 0, 16], sizes = [2, 8, 8], strides = [1, 1, 1]} : vector<2x8x32xbf16> to vector<2x8x8xbf16>
    %108 = vector.extract_strided_slice %60 {offsets = [0, 0, 16], sizes = [2, 8, 8], strides = [1, 1, 1]} : vector<2x8x32xbf16> to vector<2x8x8xbf16>
    "tpu.trace_start"() <{level = 10 : i32, message = "bqd,bkd->bqk"}> : () -> ()
    %cst_38 = arith.constant dense<0.000000e+00> : vector<2x8x8xf32>
    %109 = tpu.matmul %106, %107, %cst_38 {dimension_numbers = #tpu.dot_dimension_numbers<[2], [2], [1], [1], [0, 0, 0, 1, 1, 1], [0], [0]>} : vector<2x8x8xbf16>, vector<2x8x8xbf16>, vector<2x8x8xf32> -> vector<2x8x8xf32>
    "tpu.trace_stop"() : () -> ()
    %cst_39 = arith.constant dense<0xFF800000> : vector<2x8xf32>
    %110 = vector.multi_reduction <maximumf>, %109, %cst_39 [2] : vector<2x8x8xf32> to vector<2x8xf32>
    %111 = vector.shape_cast %110 : vector<2x8xf32> to vector<2x8x1xf32>
    %112 = vector.broadcast %111 : vector<2x8x1xf32> to vector<2x8x8xf32>
    %113 = arith.subf %109, %112 : vector<2x8x8xf32>
    %114 = math.exp %113 : vector<2x8x8xf32>
    %cst_40 = arith.constant dense<0.000000e+00> : vector<2x8xf32>
    %115 = vector.multi_reduction <add>, %114, %cst_40 [2] : vector<2x8x8xf32> to vector<2x8xf32>
    %116 = vector.shape_cast %115 : vector<2x8xf32> to vector<2x8x1xf32>
    %117 = tpu.reciprocal %116 {approx = true} : vector<2x8x1xf32> -> vector<2x8x1xf32>
    %118 = vector.broadcast %117 : vector<2x8x1xf32> to vector<2x8x8xf32>
    %119 = arith.mulf %114, %118 : vector<2x8x8xf32>
    %120 = arith.truncf %119 : vector<2x8x8xf32> to vector<2x8x8xbf16>
    "tpu.trace_start"() <{level = 10 : i32, message = "bqk,bkd->bqd"}> : () -> ()
    %cst_41 = arith.constant dense<0.000000e+00> : vector<2x8x8xf32>
    %121 = tpu.matmul %120, %108, %cst_41 {dimension_numbers = #tpu.dot_dimension_numbers<[2], [1], [1], [2], [0, 0, 0, 1, 1, 2], [0], [0]>} : vector<2x8x8xbf16>, vector<2x8x8xbf16>, vector<2x8x8xf32> -> vector<2x8x8xf32>
    "tpu.trace_stop"() : () -> ()
    %122 = vector.shape_cast %121 : vector<2x8x8xf32> to vector<16x8xf32>
    %123 = arith.truncf %122 : vector<16x8xf32> to vector<16x8xbf16>
    %124 = vector.extract_strided_slice %62 {offsets = [16, 0], sizes = [8, 32], strides = [1, 1]} : vector<32x32xbf16> to vector<8x32xbf16>
    %cst_42 = arith.constant dense<0.000000e+00> : vector<16x32xf32>
    %125 = tpu.matmul %123, %124, %cst_42 {dimension_numbers = #tpu.dot_dimension_numbers<[1], [0], [0], [1], [0, 0, 1, 1], [], []>} : vector<16x8xbf16>, vector<8x32xbf16>, vector<16x32xf32> -> vector<16x32xf32>
    %126 = arith.addf %105, %125 : vector<16x32xf32>
    %127 = vector.extract_strided_slice %58 {offsets = [0, 0, 24], sizes = [2, 8, 8], strides = [1, 1, 1]} : vector<2x8x32xbf16> to vector<2x8x8xbf16>
    %128 = vector.extract_strided_slice %59 {offsets = [0, 0, 24], sizes = [2, 8, 8], strides = [1, 1, 1]} : vector<2x8x32xbf16> to vector<2x8x8xbf16>
    %129 = vector.extract_strided_slice %60 {offsets = [0, 0, 24], sizes = [2, 8, 8], strides = [1, 1, 1]} : vector<2x8x32xbf16> to vector<2x8x8xbf16>
    "tpu.trace_start"() <{level = 10 : i32, message = "bqd,bkd->bqk"}> : () -> ()
    %cst_43 = arith.constant dense<0.000000e+00> : vector<2x8x8xf32>
    %130 = tpu.matmul %127, %128, %cst_43 {dimension_numbers = #tpu.dot_dimension_numbers<[2], [2], [1], [1], [0, 0, 0, 1, 1, 1], [0], [0]>} : vector<2x8x8xbf16>, vector<2x8x8xbf16>, vector<2x8x8xf32> -> vector<2x8x8xf32>
    "tpu.trace_stop"() : () -> ()
    %cst_44 = arith.constant dense<0xFF800000> : vector<2x8xf32>
    %131 = vector.multi_reduction <maximumf>, %130, %cst_44 [2] : vector<2x8x8xf32> to vector<2x8xf32>
    %132 = vector.shape_cast %131 : vector<2x8xf32> to vector<2x8x1xf32>
    %133 = vector.broadcast %132 : vector<2x8x1xf32> to vector<2x8x8xf32>
    %134 = arith.subf %130, %133 : vector<2x8x8xf32>
    %135 = math.exp %134 : vector<2x8x8xf32>
    %cst_45 = arith.constant dense<0.000000e+00> : vector<2x8xf32>
    %136 = vector.multi_reduction <add>, %135, %cst_45 [2] : vector<2x8x8xf32> to vector<2x8xf32>
    %137 = vector.shape_cast %136 : vector<2x8xf32> to vector<2x8x1xf32>
    %138 = tpu.reciprocal %137 {approx = true} : vector<2x8x1xf32> -> vector<2x8x1xf32>
    %139 = vector.broadcast %138 : vector<2x8x1xf32> to vector<2x8x8xf32>
    %140 = arith.mulf %135, %139 : vector<2x8x8xf32>
    %141 = arith.truncf %140 : vector<2x8x8xf32> to vector<2x8x8xbf16>
    "tpu.trace_start"() <{level = 10 : i32, message = "bqk,bkd->bqd"}> : () -> ()
    %cst_46 = arith.constant dense<0.000000e+00> : vector<2x8x8xf32>
    %142 = tpu.matmul %141, %129, %cst_46 {dimension_numbers = #tpu.dot_dimension_numbers<[2], [1], [1], [2], [0, 0, 0, 1, 1, 2], [0], [0]>} : vector<2x8x8xbf16>, vector<2x8x8xbf16>, vector<2x8x8xf32> -> vector<2x8x8xf32>
    "tpu.trace_stop"() : () -> ()
    %143 = vector.shape_cast %142 : vector<2x8x8xf32> to vector<16x8xf32>
    %144 = arith.truncf %143 : vector<16x8xf32> to vector<16x8xbf16>
    %145 = vector.extract_strided_slice %62 {offsets = [24, 0], sizes = [8, 32], strides = [1, 1]} : vector<32x32xbf16> to vector<8x32xbf16>
    %cst_47 = arith.constant dense<0.000000e+00> : vector<16x32xf32>
    %146 = tpu.matmul %144, %145, %cst_47 {dimension_numbers = #tpu.dot_dimension_numbers<[1], [0], [0], [1], [0, 0, 1, 1], [], []>} : vector<16x8xbf16>, vector<8x32xbf16>, vector<16x32xf32> -> vector<16x32xf32>
    %147 = arith.addf %126, %146 : vector<16x32xf32>
    %148 = arith.addf %3, %147 : vector<16x32xf32>
    %149 = vector.broadcast %9 : vector<1x32xf32> to vector<16x32xf32>
    %150 = arith.addf %148, %149 : vector<16x32xf32>
    %cst_48 = arith.constant dense<0.000000e+00> : vector<16xf32>
    %151 = vector.multi_reduction <add>, %150, %cst_48 [1] : vector<16x32xf32> to vector<16xf32>
    %152 = vector.shape_cast %151 : vector<16xf32> to vector<16x1xf32>
    %cst_49 = arith.constant 3.200000e+01 : f32
    %153 = vector.broadcast %cst_49 : f32 to vector<16x1xf32>
    %154 = arith.divf %152, %153 : vector<16x1xf32>
    %155 = vector.broadcast %154 : vector<16x1xf32> to vector<16x32xf32>
    %156 = arith.subf %150, %155 : vector<16x32xf32>
    %157 = arith.mulf %156, %156 : vector<16x32xf32>
    %cst_50 = arith.constant dense<0.000000e+00> : vector<16xf32>
    %158 = vector.multi_reduction <add>, %157, %cst_50 [1] : vector<16x32xf32> to vector<16xf32>
    %159 = vector.shape_cast %158 : vector<16xf32> to vector<16x1xf32>
    %cst_51 = arith.constant 3.200000e+01 : f32
    %160 = vector.broadcast %cst_51 : f32 to vector<16x1xf32>
    %161 = arith.divf %159, %160 : vector<16x1xf32>
    %162 = vector.broadcast %154 : vector<16x1xf32> to vector<16x32xf32>
    %163 = arith.subf %150, %162 : vector<16x32xf32>
    %cst_52 = arith.constant 9.99999974E-6 : f32
    %164 = vector.broadcast %cst_52 : f32 to vector<16x1xf32>
    %165 = arith.addf %161, %164 : vector<16x1xf32>
    %166 = math.rsqrt %165 : vector<16x1xf32>
    %167 = vector.broadcast %166 : vector<16x1xf32> to vector<16x32xf32>
    %168 = arith.mulf %163, %167 : vector<16x32xf32>
    %169 = vector.broadcast %12 : vector<1x32xf32> to vector<16x32xf32>
    %170 = arith.mulf %168, %169 : vector<16x32xf32>
    %171 = vector.broadcast %13 : vector<1x32xf32> to vector<16x32xf32>
    %172 = arith.addf %170, %171 : vector<16x32xf32>
    %173 = arith.truncf %172 : vector<16x32xf32> to vector<16x32xbf16>
    %c0_53 = arith.constant 0 : index
    %c0_54 = arith.constant 0 : index
    %c0_55 = arith.constant 0 : index
    %174 = vector.load %arg7[%c0_53, %c0_54, %c0_55] : memref<1x32x64xbf16, #tpu.memory_space<vmem>>, vector<1x32x64xbf16>
    %175 = vector.shape_cast %174 : vector<1x32x64xbf16> to vector<32x64xbf16>
    %cst_56 = arith.constant dense<0.000000e+00> : vector<16x64xf32>
    %176 = tpu.matmul %173, %175, %cst_56 {dimension_numbers = #tpu.dot_dimension_numbers<[1], [0], [0], [1], [0, 0, 1, 1], [], []>} : vector<16x32xbf16>, vector<32x64xbf16>, vector<16x64xf32> -> vector<16x64xf32>
    %177 = vector.broadcast %16 : vector<1x64xf32> to vector<16x64xf32>
    %178 = arith.addf %176, %177 : vector<16x64xf32>
    %cst_57 = arith.constant 0.000000e+00 : f32
    %179 = vector.broadcast %cst_57 : f32 to vector<16x64xf32>
    %180 = arith.maximumf %178, %179 : vector<16x64xf32>
    %181 = arith.truncf %180 : vector<16x64xf32> to vector<16x64xbf16>
    %c0_58 = arith.constant 0 : index
    %c0_59 = arith.constant 0 : index
    %c0_60 = arith.constant 0 : index
    %182 = vector.load %arg8[%c0_58, %c0_59, %c0_60] : memref<1x64x32xbf16, #tpu.memory_space<vmem>>, vector<1x64x32xbf16>
    %183 = vector.shape_cast %182 : vector<1x64x32xbf16> to vector<64x32xbf16>
    %cst_61 = arith.constant dense<0.000000e+00> : vector<16x32xf32>
    %184 = tpu.matmul %181, %183, %cst_61 {dimension_numbers = #tpu.dot_dimension_numbers<[1], [0], [0], [1], [0, 0, 1, 1], [], []>} : vector<16x64xbf16>, vector<64x32xbf16>, vector<16x32xf32> -> vector<16x32xf32>
    %185 = vector.broadcast %14 : vector<1x32xf32> to vector<16x32xf32>
    %186 = arith.addf %184, %185 : vector<16x32xf32>
    %187 = arith.addf %150, %186 : vector<16x32xf32>
    %c0_62 = arith.constant 0 : index
    %c0_63 = arith.constant 0 : index
    %188 = vector.load %arg13[%c0_62, %c0_63] : memref<16x32xf32, #tpu.memory_space<vmem>>, vector<16x32xf32>
    tpu.vector_store %arg13[%c0_62, %c0_63], %187 {strides = array<i32>} : memref<16x32xf32, #tpu.memory_space<vmem>>, vector<16x32xf32>,
    %c1_i32 = arith.constant 1 : i32
    %189 = arith.cmpi eq, %arg1, %c1_i32 : i32
    %190 = arith.extui %189 : i1 to i32
    %c0_i32_64 = arith.constant 0 : i32
    %191 = arith.cmpi ne, %190, %c0_i32_64 : i32
    scf.if %191 {
      %c0_65 = arith.constant 0 : index
      %c0_66 = arith.constant 0 : index
      %c0_67 = arith.constant 0 : index
      %192 = vector.load %arg11[%c0_65, %c0_66, %c0_67] : memref<1x2x32xf32, #tpu.memory_space<vmem>>, vector<1x1x32xf32>
      %193 = vector.shape_cast %192 : vector<1x1x32xf32> to vector<1x32xf32>
      %c0_68 = arith.constant 0 : index
      %c1 = arith.constant 1 : index
      %c0_69 = arith.constant 0 : index
      %194 = vector.load %arg11[%c0_68, %c1, %c0_69] : memref<1x2x32xf32, #tpu.memory_space<vmem>>, vector<1x1x32xf32>
      %195 = vector.shape_cast %194 : vector<1x1x32xf32> to vector<1x32xf32>
      %cst_70 = arith.constant dense<0.000000e+00> : vector<16xf32>
      %196 = vector.multi_reduction <add>, %187, %cst_70 [1] : vector<16x32xf32> to vector<16xf32>
      %197 = vector.shape_cast %196 : vector<16xf32> to vector<16x1xf32>
      %cst_71 = arith.constant 3.200000e+01 : f32
      %198 = vector.broadcast %cst_71 : f32 to vector<16x1xf32>
      %199 = arith.divf %197, %198 : vector<16x1xf32>
      %200 = vector.broadcast %199 : vector<16x1xf32> to vector<16x32xf32>
      %201 = arith.subf %187, %200 : vector<16x32xf32>
      %202 = arith.mulf %201, %201 : vector<16x32xf32>
      %cst_72 = arith.constant dense<0.000000e+00> : vector<16xf32>
      %203 = vector.multi_reduction <add>, %202, %cst_72 [1] : vector<16x32xf32> to vector<16xf32>
      %204 = vector.shape_cast %203 : vector<16xf32> to vector<16x1xf32>
      %cst_73 = arith.constant 3.200000e+01 : f32
      %205 = vector.broadcast %cst_73 : f32 to vector<16x1xf32>
      %206 = arith.divf %204, %205 : vector<16x1xf32>
      %207 = vector.broadcast %199 : vector<16x1xf32> to vector<16x32xf32>
      %208 = arith.subf %187, %207 : vector<16x32xf32>
      %cst_74 = arith.constant 9.99999974E-6 : f32
      %209 = vector.broadcast %cst_74 : f32 to vector<16x1xf32>
      %210 = arith.addf %206, %209 : vector<16x1xf32>
      %211 = math.rsqrt %210 : vector<16x1xf32>
      %212 = vector.broadcast %211 : vector<16x1xf32> to vector<16x32xf32>
      %213 = arith.mulf %208, %212 : vector<16x32xf32>
      %214 = vector.broadcast %193 : vector<1x32xf32> to vector<16x32xf32>
      %215 = arith.mulf %213, %214 : vector<16x32xf32>
      %216 = vector.broadcast %195 : vector<1x32xf32> to vector<16x32xf32>
      %217 = arith.addf %215, %216 : vector<16x32xf32>
      %218 = vector.shape_cast %217 : vector<16x32xf32> to vector<2x8x32xf32>
      %c0_75 = arith.constant 0 : index
      %c0_76 = arith.constant 0 : index
      %c0_77 = arith.constant 0 : index
      %219 = vector.load %arg12[%c0_75, %c0_76, %c0_77] : memref<2x8x32xf32, #tpu.memory_space<vmem>>, vector<2x8x32xf32>
      tpu.vector_store %arg12[%c0_75, %c0_76, %c0_77], %218 {strides = array<i32>} : memref<2x8x32xf32, #tpu.memory_space<vmem>>, vector<2x8x32xf32>,
    } else {
    }
    return
  }
  func.func @transform_0(%arg0: i32, %arg1: i32) -> (i32, i32, i32) {
    %c0_i32 = arith.constant 0 : i32
    %c0_i32_0 = arith.constant 0 : i32
    %c0_i32_1 = arith.constant 0 : i32
    return %arg0, %c0_i32, %c0_i32_0 : i32, i32, i32
  }
  func.func @transform_1(%arg0: i32, %arg1: i32) -> (i32, i32, i32) {
    %c0_i32 = arith.constant 0 : i32
    %c0_i32_0 = arith.constant 0 : i32
    %c0_i32_1 = arith.constant 0 : i32
    return %arg1, %c0_i32, %c0_i32_0 : i32, i32, i32
  }
  func.func @transform_2(%arg0: i32, %arg1: i32) -> (i32, i32, i32) {
    %c0_i32 = arith.constant 0 : i32
    %c0_i32_0 = arith.constant 0 : i32
    %c0_i32_1 = arith.constant 0 : i32
    return %arg1, %c0_i32, %c0_i32_0 : i32, i32, i32
  }
  func.func @transform_3(%arg0: i32, %arg1: i32) -> (i32, i32, i32) {
    %c0_i32 = arith.constant 0 : i32
    %c0_i32_0 = arith.constant 0 : i32
    %c0_i32_1 = arith.constant 0 : i32
    return %arg1, %c0_i32, %c0_i32_0 : i32, i32, i32
  }
  func.func @transform_4(%arg0: i32, %arg1: i32) -> (i32, i32, i32) {
    %c0_i32 = arith.constant 0 : i32
    %c0_i32_0 = arith.constant 0 : i32
    %c0_i32_1 = arith.constant 0 : i32
    return %arg1, %c0_i32, %c0_i32_0 : i32, i32, i32
  }
  func.func @transform_5(%arg0: i32, %arg1: i32) -> (i32, i32, i32) {
    %c0_i32 = arith.constant 0 : i32
    %c0_i32_0 = arith.constant 0 : i32
    %c0_i32_1 = arith.constant 0 : i32
    return %arg1, %c0_i32, %c0_i32_0 : i32, i32, i32
  }
  func.func @transform_6(%arg0: i32, %arg1: i32) -> (i32, i32, i32) {
    %c0_i32 = arith.constant 0 : i32
    %c0_i32_0 = arith.constant 0 : i32
    %c0_i32_1 = arith.constant 0 : i32
    return %arg1, %c0_i32, %c0_i32_0 : i32, i32, i32
  }
  func.func @transform_7(%arg0: i32, %arg1: i32) -> (i32, i32, i32) {
    %c0_i32 = arith.constant 0 : i32
    %c0_i32_0 = arith.constant 0 : i32
    %c0_i32_1 = arith.constant 0 : i32
    return %arg1, %c0_i32, %c0_i32_0 : i32, i32, i32
  }
  func.func @transform_8(%arg0: i32, %arg1: i32) -> (i32, i32, i32) {
    %c0_i32 = arith.constant 0 : i32
    %c0_i32_0 = arith.constant 0 : i32
    %c0_i32_1 = arith.constant 0 : i32
    return %arg1, %c0_i32, %c0_i32_0 : i32, i32, i32
  }
  func.func @transform_9(%arg0: i32, %arg1: i32) -> (i32, i32, i32) {
    %c0_i32 = arith.constant 0 : i32
    %c0_i32_0 = arith.constant 0 : i32
    %c0_i32_1 = arith.constant 0 : i32
    %c0_i32_2 = arith.constant 0 : i32
    return %c0_i32, %c0_i32_0, %c0_i32_1 : i32, i32, i32
  }
  func.func @transform_10(%arg0: i32, %arg1: i32) -> (i32, i32, i32) {
    %c0_i32 = arith.constant 0 : i32
    %c0_i32_0 = arith.constant 0 : i32
    %c0_i32_1 = arith.constant 0 : i32
    return %arg0, %c0_i32, %c0_i32_0 : i32, i32, i32
  }
}

</mosaic_0001>

<bundles_post_ra>
// kernel: tpu_custom_call.1
= control target key start
LH: loop header
LB: loop body
LE: loop exit
PB: predicated region body
PF: predicated region fallthrough
CT: control target
= control target key end

     0   :  { %s3475_s0 = inlined_call_operand.hbm [shape: f32[2,8,32], index: 0, kind: input, shape index: {}]   ;;  %s3476_s1 = inlined_call_operand.vmem [shape: bf16[2,32,32], index: 1, kind: input, shape index: {}]   ;;  %s3477_s2 = inlined_call_operand.vmem [shape: bf16[2,32,32], index: 2, kind: input, shape index: {}]   ;;  %s3478_s3 = inlined_call_operand.vmem [shape: bf16[2,32,32], index: 3, kind: input, shape index: {}]   ;;  %s3479_s4 = inlined_call_operand.vmem [shape: bf16[2,32,32], index: 4, kind: input, shape index: {}]   ;;  %s3480_s5 = inlined_call_operand.hbm [shape: bf16[2,32,64], index: 5, kind: input, shape index: {}]   ;;  %s3481_s6 = inlined_call_operand.vmem [shape: bf16[2,64,32], index: 6, kind: input, shape index: {}]   ;;  %s3482_s7 = inlined_call_operand.vmem [shape: f32[2,9,32], index: 7, kind: input, shape index: {}]   ;;  %s3483_s8 = inlined_call_operand.vmem [shape: f32[2,1,64], index: 8, kind: input, shape index: {}]   ;;  %s3484_s9 = inlined_call_operand.vmem [shape: f32[1,2,32], index: 9, kind: input, shape index: {}]   ;;  %s3485_s10 = inlined_call_operand.hbm [shape: f32[2,8,32], index: 10, kind: output, shape index: {}]  }
   0x1   :  { %3494 = sst [smem:[#allocation13_spill]] %s3475_s0 }
   0x2   :  { %3495 = sst [smem:[#allocation14_spill]] %s3476_s1 }
   0x3   :  { %3496 = sst [smem:[#allocation15_spill]] %s3477_s2 }
   0x4   :  { %3497 = sst [smem:[#allocation16_spill]] %s3480_s5 }
   0x5   :  { %3498 = sst [smem:[#allocation17_spill]] %s3484_s9 }
   0x6   :  { %3499 = sst [smem:[#allocation18_spill]] %s3485_s10 }
   0x7   :  { %15 = vsyncpa [#allocation4], 0 }
   0x8   :  { %16 = vsyncpa [#allocation7], 0 }
   0x9   :  { %18 = vsyncpa [#allocation7 + $0x1], 0 }
   0xa   :  { %19 = vsyncpa [#allocation5], 0  ;;  %s2949_s13 = smov 0   ;;  %s2951_s14 = smov 0  }
   0xb   :  { %s2953_s15 = smov 0   ;;  %s2955_s16 = smov 0  }
   0xc   :  { %s2957_s17 = smov 0   ;;  %s2959_s18 = smov 0  }
   0xd LB: > { %s3490_s19 = sadd.s32 4294967295, %s2878_s18   ;;  %p187_p0 = scmp.ne.s32.totalorder %s2862_s14, %s2858_s13  ;;  %s2878_s18 = sphi %s2959_s18, %s25_s18   ;;  %s2874_s17 = sphi %s2957_s17, %s3524_s17   ;;  %s2870_s16 = sphi %s2955_s16, %s3523_s16   ;;  %s2866_s15 = sphi %s2953_s15, %s3522_s15   ;;  %s2862_s14 = sphi %s2951_s14, %s3521_s14   ;;  %s2858_s13 = sphi %s2949_s13, %s3520_s13  }
   0xe   : > { %p2981_p1 = scmp.eq.s32.totalorder %s3490_s19, 0  ;;  %p2288_p2 = scmp.ge.s32.totalorder %s2878_s18, 1 }
   0xf   : > { %p323_p3 = scmp.lt.s32.totalorder %s2878_s18, 3  ;;  %s2880_s23 = smov [#allocation3]  }
  0x10   : > { %s3500_s20 = scalar_select %p2981_p1, 1, 0 }
  0x11   : > { %p2989_p4 = por %p2981_p1, %p187_p0  ;;  %p2993_p5 = pnand %p2288_p2, %p323_p3 }
  0x12   : > { %s338_s24 = sshll.u32 %s2880_s23, 4  ;;  %s34_s26 = sadd.s32 1, %s2874_s17  ;;  %s339_s24 = int_to_ptr.vmem [resolvable:$true] %s338_s24 }
  0x13   : > { %s3501_s21 = scalar_select %p2989_p4, 1, 0 }
  0x14   : > { %s3502_s22 = scalar_select %p2993_p5, 1, 0 }
  0x15   : > { %p2606_p6 = pneg %p2993_p5  ;;  %s3504_s0 = sld [smem:[#allocation13_spill]] }
  0x17   : > { %p3001_p7 = pnand %p2606_p6, %p2981_p1 }
  0x19   : > { %p2738_p9 = pneg %p3001_p7 }
  0x1b   : > { %s2736_s29 = scalar_lea.hbm %s3504_s0, 256 }
  0x1c   : > { %p2737_p8 = scmp.ne.s32.totalorder %s3504_s0, %s2736_s29  ;;  %p2743_p12 = scmp.lt.u32.totalorder %s2736_s29, %s3504_s0 }
  0x1e   : > { %p2739_p10 = pnand %p2738_p9, %p2737_p8 }
  0x20   : > { %p2740_p11 = pneg %p2739_p10 }
  0x22   : > { %p2745_p13 = pnand %p2743_p12, %p2740_p11 }
  0x24   : > { %2748 = shalt.err (!%p2745_p13)
}
  0x25   : > { %s2749_s23 = scalar_lea.vmem %s339_s24, 256  ;;  %p2757_p6 = scmp.lt.s32.totalorder %s339_s24, %s339_s24 }
  0x26   : > { %p2750_p0 = scmp.ne.s32.totalorder %s339_s24, %s2749_s23  ;;  %p2758_p4 = scmp.lt.s32.totalorder %s2749_s23, %s2749_s23 }
  0x28   : > { %p2752_p2 = pnand %p2750_p0, %p2738_p9  ;;  %p2759_p1 = por %p2758_p4, %p2757_p6 }
  0x2a   : > { %p2753_p3 = pneg %p2752_p2 }
  0x2c   : > { %p2760_p5 = pnand %p2759_p1, %p2753_p3 }
  0x2e   : > { %2763 = shalt.err (!%p2760_p5)
}
  0x2f   : > { %s2881_s27 = smov 128   ;;  %s2882_s28 = smov 8  }
  0x30   : > { %2609 = dma.hbm_to_vmem [thread:$0]  (!%p3001_p7), %s3504_s0, 256, %s339_s24, [#allocation4], %s2881_s27, %s2881_s27, %s2882_s28  }
  0x31   : > { %p35_p4 = scmp.ge.s32.totalorder %s34_s26, 2  ;;  %s174_s11 = sadd.s32 1, %s2866_s15 }
  0x32   : > { %p181_p1 = scmp.ne.s32.totalorder %s2866_s15, %s2862_s14  ;;  %p182_p5 = scmp.eq.s32.totalorder %s2878_s18, 0 }
  0x33   : > { %s3526_s26 = smov (%p35_p4, %s34_s26), 0  ;;  %p2615_p9 = scmp.lt.s32.totalorder %s2878_s18, 2 }
  0x34   : > { %3505 = sst [smem:[#allocation12_spill]] %s3526_s26  ;;  %p183_p8 = por %p182_p5, %p181_p1 }
  0x35   : > { %s171_s12 = ssub.s32 %s2874_s17, %s3526_s26  ;;  %s387_s13 = sand.u32 1, %s2866_s15  }
  0x36   : > { %p172_p10 = scmp.eq.s32.totalorder %s171_s12, 0  ;;  %s2291_s23 = sshll.u32 %s387_s13, 4 }
  0x37   : > { %s2362_s19 = sshll.u32 %s2874_s17, 8  ;;  %s3506_s5 = sld [smem:[#allocation16_spill]] }
  0x38   : > { %s3034_s10 = scalar_select %p172_p10, %s2866_s15, %s174_s11  }
  0x39   : > { %s391_s27 = scalar_lea.vmem [#allocation6], %s2291_s23  ;;  %p3041_p7 = pnand %p2615_p9, %p183_p8 }
  0x3a   : > { %s398_s28 = sshll.u32 %s391_s27, 4  ;;  %s3047_s30 = scalar_lea.sflag [#allocation7], %s387_s13  ;;  %s3045_s28 = int_to_ptr.vmem [resolvable:$true] %s398_s28 }
  0x3b   : > { %p2766_p12 = pneg %p3041_p7 }
  0x3d   : > { %s3039_s24 = scalar_lea.hbm %s3506_s5, %s2362_s19  ;;  %s2769_s12 = scalar_lea.hbm %s3506_s5, 512 }
  0x3e   : > { %s2764_s11 = scalar_lea.hbm %s3039_s24, 256  ;;  %p2770_p2 = scmp.lt.u32.totalorder %s3039_s24, %s3506_s5 }
  0x3f   : > { %p2765_p11 = scmp.ne.s32.totalorder %s3039_s24, %s2764_s11  ;;  %p2771_p3 = scmp.lt.u32.totalorder %s2769_s12, %s2764_s11 }
  0x40   : > { %p2773_p4 = scmp.lt.u32.totalorder %s2764_s11, %s3039_s24 }
  0x41   : > { %p2767_p13 = pnand %p2766_p12, %p2765_p11  ;;  %p2772_p6 = por %p2771_p3, %p2770_p2 }
  0x43   : > { %p2768_p0 = pneg %p2767_p13  ;;  %p2774_p1 = por %p2773_p4, %p2772_p6 }
  0x45   : > { %p2775_p5 = pnand %p2774_p1, %p2768_p0 }
  0x47   : > { %2778 = shalt.err (!%p2775_p5)
}
  0x48   : > { %s2779_s13 = scalar_lea.vmem %s3045_s28, 256  ;;  %s2883_s27 = smov [#allocation6]  }
  0x49   : > { %p2780_p8 = scmp.ne.s32.totalorder %s3045_s28, %s2779_s13  ;;  %s2784_s9 = sshll.u32 %s2883_s27, 4  ;;  %s2785_s9 = int_to_ptr.vmem [resolvable:$false] %s2784_s9 }
  0x4a   : > { %s2786_s19 = scalar_lea.vmem %s2785_s9, 512  ;;  %p2787_p11 = scmp.lt.s32.totalorder %s3045_s28, %s2785_s9 }
  0x4b   : > { %p2782_p9 = pnand %p2780_p8, %p2766_p12  ;;  %p2788_p13 = scmp.lt.s32.totalorder %s2786_s19, %s2779_s13 }
  0x4d   : > { %p2783_p10 = pneg %p2782_p9  ;;  %p2789_p2 = por %p2788_p13, %p2787_p11 }
  0x4f   : > { %p2790_p3 = pnand %p2789_p2, %p2783_p10 }
  0x51   : > { %2793 = shalt.err (!%p2790_p3)
}
  0x52   : > { %s2884_s11 = smov 64   ;;  %s2885_s12 = smov 4  }
  0x53   : > { %2613 = dma.hbm_to_vmem [thread:$0]  (!%p3041_p7), %s3039_s24, 256, %s3045_s28, %s3047_s30, %s2884_s11, %s2884_s11, %s2885_s12  }
  0x54   : > { %p3508_p12 = scmp.ne.s32.totalorder %s3502_s22, 0 }
  0x55   : > { %p3509_p0 = scmp.ne.s32.totalorder (!%p3508_p12), %s3500_s20, 0 }
  0x56   : > { %432 = sbr.rel (%p3508_p12) target bundleno = 4763 (0x129b), region = 60 }
  0x5d   : > { %2845 = dma.done.wait (%p3509_p0), [#allocation4], 256  }
  0x5e   : > { %2847 = vsyncadd (%p3509_p0), [#allocation4], 4294967040  ;;  %s438_s23 = sand.u32 1, %s2862_s14   ;;  %p3510_p6 = scmp.ne.s32.totalorder %s3501_s21, 0 }
  0x5f   : > { %s3082_s25 = sshll.u32 %s438_s23, 4  ;;  %s439_s13 = scalar_lea.sflag [#allocation7], %s438_s23 }
  0x60   : > { %2849 = dma.done.wait (%p3510_p6), %s439_s13, 256  }
  0x61   : > { %2851 = vsyncadd (%p3510_p6), %s439_s13, 4294967040  ;;  %p508_p7 = scmp.lt.s32.totalorder %s2870_s16, 1  ;;  %s3511_s1 = sld [smem:[#allocation14_spill]] }
  0x62   : > { %s3512_s2 = sld [smem:[#allocation15_spill]]  ;;  %p2309_p4 = scmp.ne.s32.totalorder %s2870_s16, 0 }
  0x63   : > { %s3091_s22 = scalar_select %p508_p7, %s2870_s16, 1 }
  0x64   : > { %546 = sbr.rel (%p2309_p4) target bundleno = 107 (0x6b), region = 72  ;;  %v547_v0 = vld [vmem:[#allocation3] sm:$0xff] (!%p2309_p4)  ;;  %vm549_vm0 = vcmask (!%p2309_p4), 261120   ;;  %v548_v1 = vld [vmem:[#allocation3 + $0x8] sm:$0xff] (!%p2309_p4) }
  0x65   : > { %s2363_s20 = sshll.u32 %s3091_s22, 4  ;;  %s2367_s24 = sshll.u32 %s3091_s22, 5  ;;  %550 = vst.msk [vmem:[#allocation2] sm:$0xff] (!%p2309_p4), %vm549_vm0, %v547_v0  ;;  %551 = vst.msk [vmem:[#allocation2 + $0x8] sm:$0xff] (!%p2309_p4), %vm549_vm0, %v548_v1 }
  0x66   : > { %s3108_s23 = scalar_lea.vmem %s3478_s3, %s2363_s20  ;;  %s3113_s0 = scalar_lea.vmem %s3479_s4, %s2363_s20 }
  0x67   : > { %s3098_s30 = scalar_lea.vmem %s3511_s1, %s2363_s20  ;;  %s3118_s28 = scalar_lea.vmem %s3481_s6, %s2367_s24 }
  0x68   : > { %s3103_s21 = scalar_lea.vmem %s3512_s2, %s2363_s20  ;;  %s3123_s9 = scalar_lea.vmem %s3482_s7, %s2363_s20 }
  0x69   : > { %s540_s11 = scalar_lea.vmem %s3483_s8, %s3091_s22 }
  0x6b PF: > { %vm557_vm1 = vcmask 261120   ;;  %v2680_v16 = vld [vmem:[%s3098_s30] sm:$0xff]   ;;  %v2886_v18 = vmov 0.0   ;;  %v2682_v19 = vld [vmem:[%s3098_s30 + $0x8] sm:$0xff]   ;;  %vm2887_vm2 = vmmov 0   ;;  %v585_v25 = vlaneseq  ;;  %s2888_s1 = smov 120  }
  0x6c   : > { %v3130_v2 = vld [vmem:[#allocation2] sm:$0xff]  ;;  %v3132_v3 = vld [vmem:[#allocation2 + $0x8] sm:$0xff]  ;;  %2432 = vmatprep.subr.bf16.mxu1 %v2886_v18  ;;  %2448 = vmatprep.subr.bf16.mxu0 %v2886_v18  ;;  %vm806_vm3 = vcmask 64512   ;;  %vm926_vm4 = vcmask 1043456   ;;  %s2889_s2 = smov 112   ;;  %s2890_s5 = smov 104  }
  0x6d   : > { %v558_v4 = vsel %vm557_vm1, %v3130_v2, 0.0  ;;  %v561_v5 = vsel %vm557_vm1, %v3132_v3, 0.0  ;;  %v2681_v17 = vld [vmem:[%s3108_s23] sm:$0xff]   ;;  %2433 = vmatpush3.bf16.msra.mxu1 %v2680_v16  ;;  %v2683_v20 = vld [vmem:[%s3108_s23 + $0x8] sm:$0xff]   ;;  %2436 = vmatprep.mubr.msk.bf16.mxu1 %vm2887_vm2, %v2886_v18  ;;  %v3156_v28 = vshrl.u32 %v585_v25, 7  ;;  %vm2024_vm5 = vcmask 523264  }
  0x6e   : > { %559 = vadd.xlane.f32.xlu0 %v558_v4  ;;  %2449 = vmatpush3.bf16.msra.mxu0 %v2681_v17  ;;  %v3160_v30 = vld [vmem:[%s3123_s9] sm:$0xff]  ;;  %v2685_v44 = vld [vmem:[%s3103_s21 + $0x8] sm:$0xff]   ;;  %p2355_p1 = scmp.ne.s32.totalorder %s2870_s16, 1 }
  0x6f   : > { %2434 = vmatprep.subr.bf16.mxu1 %v2886_v18  ;;  %2450 = vmatprep.subr.bf16.mxu0 %v2886_v18  ;;  %v587_v29 = vsub.s32 4, %v3156_v28  ;;  %v593_v34 = vsub.s32 5, %v3156_v28  ;;  %v2684_v42 = vld [vmem:[%s3103_s21] sm:$0xff]   ;;  %v669_v49 = vsub.s32 1, %v3156_v28  ;;  %v731_v54 = vsub.s32 2, %v3156_v28  ;;  %s3515_s20 = sld [smem:[#allocation17_spill]] (!%p2355_p1) }
  0x70   : > { %2452 = vmatprep.mubr.msk.bf16.mxu0 %vm2887_vm2, %v2886_v18  ;;  %v604_v56 = vsub.s32 0, %v3156_v28 }
  0x71   : > { %2435 = vmatpush3.bf16.msra.mxu1 %v2682_v19  ;;  %v588_v33 = vrot.slane %v3160_v30, %v587_v29  ;;  %v594_v38 = vrot.slane %v3160_v30, %v593_v34  ;;  %v670_v55 = vrot.slane %v3160_v30, %v669_v49  ;;  %v732_v58 = vrot.slane %v3160_v30, %v731_v54 }
  0x72   : > { %562 = vadd.xlane.f32.xlu0 %v561_v5  ;;  %2451 = vmatpush3.bf16.msra.mxu0 %v2683_v20  ;;  %v605_v62 = vrot.slane %v3160_v30, %v604_v56 }
  0x73   : > { %2440 = vmatprep.subr.bf16.mxu1 %v2886_v18  ;;  %2462 = vmatprep.subr.bf16.mxu0 %v2886_v18 }
  0xfb   : > { %v560_v6 = vpop.xlane.xlu0 %559 }
  0xfc   : > { %v565_v7 = vmul.f32 0.03125, %v560_v6 }
  0xfe   : > { %v567_v8 = vsub.f32 %v3130_v2, %v565_v7 }
  0xff   : > { %v563_v9 = vpop.xlane.xlu0 %562 }
 0x100   : > { %v566_v10 = vmul.f32 0.03125, %v563_v9  ;;  %v569_v11 = vmul.f32 %v567_v8, %v567_v8 }
 0x102   : > { %v568_v12 = vsub.f32 %v3132_v3, %v566_v10  ;;  %v571_v13 = vsel %vm557_vm1, %v569_v11, 0.0 }
 0x103   : > { %572 = vadd.xlane.f32.xlu1 %v571_v13 }
 0x104   : > { %v570_v14 = vmul.f32 %v568_v12, %v568_v12 }
 0x106   : > { %v574_v15 = vsel %vm557_vm1, %v570_v14, 0.0 }
 0x107   : > { %575 = vadd.xlane.f32.xlu1 %v574_v15 }
 0x190   : > { %v573_v21 = vpop.xlane.xlu1 %572 }
 0x191   : > { %v577_v22 = vmul.f32 0.03125, %v573_v21 }
 0x193   : > { %v579_v23 = vadd.f32 1e-05, %v577_v22 }
 0x194   : > { %v576_v24 = vpop.xlane.xlu1 %575 }
 0x195   : > { %2692 = vrsqrt.f32 %v579_v23  ;;  %v578_v26 = vmul.f32 0.03125, %v576_v24 }
 0x197   : > { %v580_v27 = vadd.f32 1e-05, %v578_v26 }
 0x199   : > { %2694 = vrsqrt.f32 %v580_v27 }
 0x19f   : > { %v2693_v31 = vpop.eup %2692 }
 0x1a0   : > { %v583_v32 = vmul.f32 %v2693_v31, %v567_v8 }
 0x1a2   : > { %v589_v37 = vmul.f32 %v588_v33, %v583_v32 }
 0x1a3   : > { %v2695_v35 = vpop.eup %2694 }
 0x1a4   : > { %v584_v36 = vmul.f32 %v2695_v35, %v568_v12  ;;  %v595_v40 = vadd.f32 %v594_v38, %v589_v37 }
 0x1a6   : > { %v590_v39 = vmul.f32 %v588_v33, %v584_v36 }
 0x1a8   : > { %v596_v41 = vadd.f32 %v594_v38, %v590_v39 }
 0x1aa   : > { %v597_v43 = vpack.c.bf16 %v596_v41, %v595_v40 }
 0x1ac   : > { %2437 = vmatmul.mubr.msk.bf16.vlgmr.msra.gmra.mrb[0].mxu1 %vm557_vm1, %v597_v43  ;;  %2453 = vmatmul.mubr.msk.bf16.vlgmr.msra.gmra.mrb[0].mxu0 %vm557_vm1, %v597_v43 }
 0x1ad   : > { %2441 = vmatpush3.bf16.msra.mxu1 %v2684_v42  ;;  %2444 = vmatprep.mubr.msk.bf16.mxu1 %vm2887_vm2, %v2886_v18 }
 0x1ae   : > { %2442 = vmatprep.subr.bf16.mxu1 %v2886_v18  ;;  %2464 = vmatprep.mubr.msk.bf16.mxu0 %vm2887_vm2, %v2886_v18 }
 0x1b1   : > { %2443 = vmatpush3.bf16.msra.mxu1 %v2685_v44 }
 0x1b2   : > { %2456 = vmatprep.subr.bf16.mxu1 %v2886_v18 }
 0x1b4   : > { %2445 = vmatmul.mubr.msk.bf16.vlgmr.msra.gmra.mrb[4].mxu1 %vm557_vm1, %v597_v43 }
 0x1b5   : > { %2458 = vmatprep.mubr.msk.bf16.mxu1 %vm2887_vm2, %v2886_v18 }
 0x27f   : > { %v655_v45 = vpop.f32.mrb[0].mxu1  ;;  %v779_v46 = vpop.f32.mrb[0].mxu0 }
 0x280   : > { %v2438_v47 = vpop.f32.mrb[1].mxu1  ;;  %v2454_v48 = vpop.f32.mrb[1].mxu0  ;;  %v780_v4 = vadd.f32 %v779_v46, %v732_v58  ;;  %v656_v7 = vadd.f32 %v655_v45, %v605_v62 }
 0x281   : > { %v658_v50 = vpop.f32.mrb[2].mxu1  ;;  %v782_v51 = vpop.f32.mrb[2].mxu0 }
 0x282   : > { %v2439_v52 = vpop.f32.mrb[3].mxu1  ;;  %v2455_v53 = vpop.f32.mrb[3].mxu0  ;;  %v783_v8 = vadd.f32 %v782_v51, %v732_v58  ;;  %v3193_v10 = vpack.c.bf16 %v780_v4, %v780_v4  ;;  %v659_v11 = vadd.f32 %v658_v50, %v605_v62  ;;  %v3196_v12 = vpack.c.bf16 %v656_v7, %v656_v7 }
 0x284   : > { %v3198_v13 = vpack.c.bf16 %v783_v8, %v783_v8  ;;  %v3200_v14 = vpack.c.bf16 %v659_v11, %v659_v11  ;;  %v928_v15 = vsel %vm926_vm4, %v3193_v10, 0 }
 0x286   : > { %v974_v16 = vsel %vm926_vm4, %v3198_v13, 0 }
 0x287   : > { %v717_v57 = vpop.f32.mrb[4].mxu1 }
 0x288   : > { %v718_v59 = vadd.f32 %v717_v57, %v670_v55  ;;  %v2446_v60 = vpop.f32.mrb[5].mxu1 }
 0x289   : > { %v720_v61 = vpop.f32.mrb[6].mxu1 }
 0x28a   : > { %v3184_v63 = vpack.c.bf16 %v718_v59, %v718_v59  ;;  %v721_v0 = vadd.f32 %v720_v61, %v670_v55  ;;  %v2447_v1 = vpop.f32.mrb[7].mxu1 }
 0x28c   : > { %v3186_v5 = vpack.c.bf16 %v721_v0, %v721_v0  ;;  %v811_v6 = vsel %vm806_vm3, %v3184_v63, 0 }
 0x28d   : > { %2457 = vmatpush3.bf16.xpose.msra.mxu1 %v811_v6 }
 0x28e   : > { %v857_v9 = vsel %vm806_vm3, %v3186_v5, 0  ;;  %2468 = vmatprep.subr.bf16.mxu1 %v2886_v18 }
 0x28f   : > { %2463 = vmatpush3.bf16.xpose.msra.mxu0 %v857_v9 }
 0x290   : > { %2474 = vmatprep.subr.bf16.mxu0 %v2886_v18 }
 0x294   : > { %2459 = vmatmul.mubr.msk.bf16.vlgmr.msra.gmra.mrb[8].mxu1 %vm806_vm3, %v3196_v12 }
 0x295   : > { %2469 = vmatpush3.bf16.msra.mxu1 %v928_v15  ;;  %2470 = vmatprep.mubr.msk.bf16.mxu1 %vm2887_vm2, %v2886_v18 }
 0x296   : > { %2465 = vmatmul.mubr.msk.bf16.vlgmr.msra.gmra.mrb[4].mxu0 %vm806_vm3, %v3200_v14  ;;  %2480 = vmatprep.subr.bf16.mxu1 %v2886_v18 }
 0x297   : > { %2475 = vmatpush3.bf16.msra.mxu0 %v974_v16  ;;  %2476 = vmatprep.mubr.msk.bf16.mxu0 %vm2887_vm2, %v2886_v18 }
 0x298   : > { %2486 = vmatprep.subr.bf16.mxu0 %v2886_v18 }
 0x367   : > { %v847_v17 = vpop.f32.mrb[8].mxu1 }
 0x368   : > { %v2460_v19 = vpop.f32.mrb[9].mxu1  ;;  %v899_v20 = vsel %vm806_vm3, %v847_v17, -inf }
 0x369   : > { %v893_v21 = vpop.f32.mrb[4].mxu0  ;;  %900 = vmax.xlane.f32.xlu0 %v899_v20  ;;  %v850_v22 = vpop.f32.mrb[10].mxu1 }
 0x36a   : > { %v2461_v23 = vpop.f32.mrb[11].mxu1  ;;  %v2466_v24 = vpop.f32.mrb[5].mxu0  ;;  %v902_v25 = vsel %vm806_vm3, %v893_v21, -inf }
 0x36b   : > { %903 = vmax.xlane.f32.xlu1 %v902_v25  ;;  %v896_v26 = vpop.f32.mrb[6].mxu0 }
 0x36c   : > { %v2467_v27 = vpop.f32.mrb[7].mxu0 }
 0x37c   : > { %1069 = vrot.lane.b32.xlu1 %v3186_v5, %s2888_s1 }
 0x3f6   : > { %v901_v29 = vpop.xlane.xlu0 %900 }
 0x3f7   : > { %v905_v31 = vsub.f32 %v847_v17, %v901_v29 }
 0x3f8   : > { %v904_v32 = vpop.xlane.xlu1 %903 }
 0x3f9   : > { %v907_v33 = vmul.f32 1.442695, %v905_v31  ;;  %v906_v34 = vsub.f32 %v893_v21, %v904_v32 }
 0x3fb   : > { %2696 = vpow2.f32 %v907_v33  ;;  %v909_v35 = vmul.f32 1.442695, %v906_v34 }
 0x3fc   : > { %v1070_v40 = vpop.permute.xlu1 %1069 }
 0x3fd   : > { %2698 = vpow2.f32 %v909_v35  ;;  %v1075_v51 = vsel %vm806_vm3, %v1070_v40, 0 }
 0x405   : > { %v2697_v36 = vpop.eup %2696 }
 0x406   : > { %v911_v37 = vsel %vm806_vm3, %v2697_v36, 0.0 }
 0x407   : > { %v2699_v38 = vpop.eup %2698  ;;  %912 = vadd.xlane.f32.xlu0 %v911_v37  ;;  %v803_v37 = vld [vmem:[%s3113_s0 + $0x4] sm:$0xf] }
 0x408   : > { %v914_v39 = vsel %vm806_vm3, %v2699_v38, 0.0  ;;  %v1242_v40 = vsel %vm926_vm4, %v803_v37, 0 }
 0x409   : > { %915 = vadd.xlane.f32.xlu1 %v914_v39 }
 0x41a   : > { %1017 = vrot.lane.b32.xlu1 %v3196_v12, %s2888_s1 }
 0x41d   : > { %1019 = vrot.lane.b32.xlu0 %v3184_v63, %s2888_s1 }
 0x41e   : > { %1067 = vrot.lane.b32.xlu1 %v3200_v14, %s2888_s1 }
 0x494   : > { %v913_v41 = vpop.xlane.xlu0 %912 }
 0x495   : > { %2700 = vrcp.f32 %v913_v41 }
 0x496   : > { %v916_v42 = vpop.xlane.xlu1 %915 }
 0x497   : > { %2702 = vrcp.f32 %v916_v42  ;;  %v802_v42 = vld [vmem:[%s3113_s0] sm:$0xf] }
 0x498   : > { %v1020_v46 = vpop.permute.xlu0 %1019 }
 0x499   : > { %v1025_v49 = vsel %vm806_vm3, %v1020_v46, 0 }
 0x49a   : > { %v1018_v52 = vpop.permute.xlu1 %1017 }
 0x49e   : > { %v1068_v53 = vpop.permute.xlu1 %1067 }
 0x49f   : > { %v2701_v43 = vpop.eup %2700 }
 0x4a0   : > { %v919_v44 = vmul.f32 %v2701_v43, %v2697_v36 }
 0x4a1   : > { %v2703_v45 = vpop.eup %2702 }
 0x4a2   : > { %v920_v47 = vmul.f32 %v2703_v45, %v2699_v38  ;;  %v921_v48 = vpack.c.bf16 %v919_v44, %v919_v44  ;;  %v1289_v45 = vsel %vm926_vm4, %v802_v42, 0 }
 0x4a4   : > { %2471 = vmatmul.mubr.msk.bf16.vlgmr.msra.gmra.mrb[12].mxu1 %vm806_vm3, %v921_v48  ;;  %v922_v50 = vpack.c.bf16 %v920_v47, %v920_v47 }
 0x4a5   : > { %2481 = vmatpush3.bf16.xpose.msra.mxu1 %v1025_v49  ;;  %2482 = vmatprep.mubr.msk.bf16.mxu1 %vm2887_vm2, %v2886_v18 }
 0x4a6   : > { %2477 = vmatmul.mubr.msk.bf16.vlgmr.msra.gmra.mrb[8].mxu0 %vm806_vm3, %v922_v50  ;;  %2492 = vmatprep.subr.bf16.mxu1 %v2886_v18 }
 0x4a7   : > { %2487 = vmatpush3.bf16.xpose.msra.mxu0 %v1075_v51  ;;  %2488 = vmatprep.mubr.msk.bf16.mxu0 %vm2887_vm2, %v2886_v18 }
 0x4a8   : > { %2498 = vmatprep.subr.bf16.mxu0 %v2886_v18 }
 0x4ac   : > { %2483 = vmatmul.mubr.msk.bf16.vlgmr.msra.gmra.mrb[16].mxu1 %vm806_vm3, %v1018_v52 }
 0x4ad   : > { %2494 = vmatprep.mubr.msk.bf16.mxu1 %vm2887_vm2, %v2886_v18 }
 0x4ae   : > { %2489 = vmatmul.mubr.msk.bf16.vlgmr.msra.gmra.mrb[12].mxu0 %vm806_vm3, %v1068_v53 }
 0x4af   : > { %2500 = vmatprep.mubr.msk.bf16.mxu0 %vm2887_vm2, %v2886_v18 }
 0x577   : > { %v3244_v54 = vpop.f32.mrb[12].mxu1 }
 0x578   : > { %v2472_v55 = vpop.f32.mrb[13].mxu1 }
 0x579   : > { %v967_v56 = vpop.f32.mrb[14].mxu1  ;;  %v3246_v57 = vpop.f32.mrb[8].mxu0 }
 0x57a   : > { %v1016_v58 = vpack.c.bf16 %v3246_v57, %v3244_v54  ;;  %v2473_v59 = vpop.f32.mrb[15].mxu1  ;;  %v2478_v60 = vpop.f32.mrb[9].mxu0 }
 0x57b   : > { %v1013_v61 = vpop.f32.mrb[10].mxu0 }
 0x57c   : > { %v2479_v62 = vpop.f32.mrb[11].mxu0 }
 0x57f   : > { %v1061_v0 = vpop.f32.mrb[16].mxu1 }
 0x580   : > { %v2484_v1 = vpop.f32.mrb[17].mxu1  ;;  %v1117_v4 = vsel %vm806_vm3, %v1061_v0, -inf }
 0x581   : > { %v1111_v6 = vpop.f32.mrb[12].mxu0  ;;  %1118 = vmax.xlane.f32.xlu0 %v1117_v4  ;;  %v1064_v7 = vpop.f32.mrb[18].mxu1 }
 0x582   : > { %v2485_v8 = vpop.f32.mrb[19].mxu1  ;;  %v2490_v9 = vpop.f32.mrb[13].mxu0  ;;  %v1120_v11 = vsel %vm806_vm3, %v1111_v6, -inf }
 0x583   : > { %1121 = vmax.xlane.f32.xlu1 %v1120_v11  ;;  %v1114_v15 = vpop.f32.mrb[14].mxu0 }
 0x584   : > { %v2491_v16 = vpop.f32.mrb[15].mxu0 }
 0x594   : > { %1189 = vrot.lane.b32.xlu1 %v3198_v13, %s2888_s1 }
 0x598   : > { %1334 = vrot.lane.b32.xlu1 %v3184_v63, %s2889_s2 }
 0x59c   : > { %1384 = vrot.lane.b32.xlu1 %v3186_v5, %s2889_s2 }
 0x5a0   : > { %1382 = vrot.lane.b32.xlu1 %v3200_v14, %s2889_s2 }
 0x60e   : > { %v1119_v17 = vpop.xlane.xlu0 %1118 }
 0x60f   : > { %v1123_v19 = vsub.f32 %v1061_v0, %v1119_v17 }
 0x610   : > { %v1122_v20 = vpop.xlane.xlu1 %1121 }
 0x611   : > { %v1125_v21 = vmul.f32 1.442695, %v1123_v19  ;;  %v1124_v22 = vsub.f32 %v1111_v6, %v1122_v20 }
 0x613   : > { %2704 = vpow2.f32 %v1125_v21  ;;  %v1127_v23 = vmul.f32 1.442695, %v1124_v22 }
 0x614   : > { %v1190_v24 = vpop.permute.xlu1 %1189 }
 0x615   : > { %2706 = vpow2.f32 %v1127_v23  ;;  %v1195_v25 = vsel %vm926_vm4, %v1190_v24, 0 }
 0x616   : > { %2499 = vmatpush3.bf16.msra.mxu0 %v1195_v25 }
 0x617   : > { %2510 = vmatprep.subr.bf16.mxu0 %v2886_v18 }
 0x618   : > { %v1335_v46 = vpop.permute.xlu1 %1334 }
 0x61c   : > { %v1385_v47 = vpop.permute.xlu1 %1384 }
 0x61d   : > { %v2705_v26 = vpop.eup %2704  ;;  %v1390_v48 = vsel %vm806_vm3, %v1385_v47, 0 }
 0x61e   : > { %v1129_v27 = vsel %vm806_vm3, %v2705_v26, 0.0 }
 0x61f   : > { %v2707_v29 = vpop.eup %2706  ;;  %1130 = vadd.xlane.f32.xlu0 %v1129_v27 }
 0x620   : > { %v1132_v31 = vsel %vm806_vm3, %v2707_v29, 0.0  ;;  %v1383_v49 = vpop.permute.xlu1 %1382 }
 0x623   : > { %1133 = vadd.xlane.f32.xlu0 %v1132_v31 }
 0x639   : > { %1141 = vrot.lane.b32.xlu0 %v3193_v10, %s2888_s1 }
 0x63d   : > { %1332 = vrot.lane.b32.xlu0 %v3196_v12, %s2889_s2 }
 0x6ac   : > { %v1131_v32 = vpop.xlane.xlu0 %1130 }
 0x6ad   : > { %2708 = vrcp.f32 %v1131_v32 }
 0x6b0   : > { %v1134_v33 = vpop.xlane.xlu0 %1133 }
 0x6b1   : > { %2710 = vrcp.f32 %v1134_v33 }
 0x6b4   : > { %v1142_v34 = vpop.permute.xlu0 %1141 }
 0x6b5   : > { %v1147_v35 = vsel %vm926_vm4, %v1142_v34, 0 }
 0x6b6   : > { %2493 = vmatpush3.bf16.msra.mxu1 %v1147_v35 }
 0x6b7   : > { %v2709_v36 = vpop.eup %2708  ;;  %2504 = vmatprep.subr.bf16.mxu1 %v2886_v18 }
 0x6b8   : > { %v1137_v38 = vmul.f32 %v2709_v36, %v2705_v26  ;;  %v1333_v62 = vpop.permute.xlu0 %1332 }
 0x6ba   : > { %v1139_v39 = vpack.c.bf16 %v1137_v38, %v1137_v38 }
 0x6bb   : > { %v2711_v41 = vpop.eup %2710 }
 0x6bc   : > { %v1138_v43 = vmul.f32 %v2711_v41, %v2707_v29  ;;  %2495 = vmatmul.mubr.msk.bf16.vlgmr.msra.gmra.mrb[20].mxu1 %vm806_vm3, %v1139_v39 }
 0x6bd   : > { %2505 = vmatpush3.bf16.msra.mxu1 %v1242_v40  ;;  %2506 = vmatprep.mubr.msk.bf16.mxu1 %vm2887_vm2, %v2886_v18 }
 0x6be   : > { %v1140_v44 = vpack.c.bf16 %v1138_v43, %v1138_v43  ;;  %2516 = vmatprep.subr.bf16.mxu1 %v2886_v18 }
 0x6c0   : > { %2501 = vmatmul.mubr.msk.bf16.vlgmr.msra.gmra.mrb[16].mxu0 %vm806_vm3, %v1140_v44 }
 0x6c1   : > { %2511 = vmatpush3.bf16.msra.mxu0 %v1289_v45  ;;  %2512 = vmatprep.mubr.msk.bf16.mxu0 %vm2887_vm2, %v2886_v18 }
 0x6c2   : > { %2522 = vmatprep.subr.bf16.mxu0 %v2886_v18 }
 0x6c8   : > { %2513 = vmatmul.mubr.msk.bf16.vlgmr.msra.gmra.mrb[20].mxu0 %vm806_vm3, %v1016_v58  ;;  %v1340_v58 = vsel %vm806_vm3, %v1335_v46, 0 }
 0x6c9   : > { %2524 = vmatprep.mubr.msk.bf16.mxu0 %vm2887_vm2, %v2886_v18 }
 0x6ca   : > { %2523 = vmatpush3.bf16.xpose.msra.mxu0 %v1390_v48 }
 0x6cb   : > { %2534 = vmatprep.subr.bf16.mxu0 %v2886_v18 }
 0x6d1   : > { %2525 = vmatmul.mubr.msk.bf16.vlgmr.msra.gmra.mrb[24].mxu0 %vm806_vm3, %v1383_v49 }
 0x6d2   : > { %2536 = vmatprep.mubr.msk.bf16.mxu0 %vm2887_vm2, %v2886_v18 }
 0x78f   : > { %v1183_v50 = vpop.f32.mrb[20].mxu1 }
 0x790   : > { %v2496_v51 = vpop.f32.mrb[21].mxu1 }
 0x791   : > { %v1186_v52 = vpop.f32.mrb[22].mxu1 }
 0x792   : > { %v2497_v53 = vpop.f32.mrb[23].mxu1 }
 0x793   : > { %v1231_v54 = vpop.f32.mrb[16].mxu0  ;;  %v804_v53 = vld [vmem:[%s3113_s0 + $0x8] sm:$0xf] }
 0x794   : > { %v1237_v55 = vpack.c.bf16 %v1231_v54, %v1183_v50  ;;  %v2502_v56 = vpop.f32.mrb[17].mxu0  ;;  %v1557_v54 = vsel %vm926_vm4, %v804_v53, 0  ;;  %v1876_v53 = vsub.s32 3, %v3156_v28 }
 0x795   : > { %v1234_v57 = vpop.f32.mrb[18].mxu0 }
 0x796   : > { %v2503_v59 = vpop.f32.mrb[19].mxu0  ;;  %2507 = vmatmul.mubr.msk.bf16.vlgmr.msra.gmra.mrb[24].mxu1 %vm806_vm3, %v1237_v55 }
 0x797   : > { %2517 = vmatpush3.bf16.xpose.msra.mxu1 %v1340_v58  ;;  %2518 = vmatprep.mubr.msk.bf16.mxu1 %vm2887_vm2, %v2886_v18 }
 0x798   : > { %2528 = vmatprep.subr.bf16.mxu1 %v2886_v18 }
 0x79b   : > { %v1325_v60 = vpop.f32.mrb[20].mxu0 }
 0x79c   : > { %v2514_v61 = vpop.f32.mrb[21].mxu0 }
 0x79d   : > { %v1328_v0 = vpop.f32.mrb[22].mxu0 }
 0x79e   : > { %v2515_v1 = vpop.f32.mrb[23].mxu0  ;;  %2519 = vmatmul.mubr.msk.bf16.vlgmr.msra.gmra.mrb[28].mxu1 %vm806_vm3, %v1333_v62 }
 0x79f   : > { %2530 = vmatprep.mubr.msk.bf16.mxu1 %vm2887_vm2, %v2886_v18 }
 0x7a4   : > { %v1426_v4 = vpop.f32.mrb[24].mxu0 }
 0x7a5   : > { %v2526_v6 = vpop.f32.mrb[25].mxu0  ;;  %v1435_v7 = vsel %vm806_vm3, %v1426_v4, -inf }
 0x7a6   : > { %1436 = vmax.xlane.f32.xlu1 %v1435_v7  ;;  %v1429_v8 = vpop.f32.mrb[26].mxu0 }
 0x7a7   : > { %v2527_v9 = vpop.f32.mrb[27].mxu0 }
 0x7b7   : > { %1504 = vrot.lane.b32.xlu1 %v3198_v13, %s2889_s2 }
 0x7bb   : > { %1604 = vrot.lane.b32.xlu1 %v3184_v63, %s2890_s5 }
 0x7bf   : > { %1654 = vrot.lane.b32.xlu1 %v3186_v5, %s2890_s5 }
 0x7c3   : > { %1652 = vrot.lane.b32.xlu1 %v3200_v14, %s2890_s5 }
 0x833   : > { %v1437_v11 = vpop.xlane.xlu1 %1436 }
 0x834   : > { %v1439_v17 = vsub.f32 %v1426_v4, %v1437_v11 }
 0x836   : > { %v1442_v19 = vmul.f32 1.442695, %v1439_v17 }
 0x837   : > { %v1505_v15 = vpop.permute.xlu1 %1504 }
 0x838   : > { %v1510_v16 = vsel %vm926_vm4, %v1505_v15, 0  ;;  %2712 = vpow2.f32 %v1442_v19 }
 0x839   : > { %2535 = vmatpush3.bf16.msra.mxu0 %v1510_v16 }
 0x83a   : > { %2546 = vmatprep.subr.bf16.mxu0 %v2886_v18 }
 0x83b   : > { %v1605_v40 = vpop.permute.xlu1 %1604 }
 0x83c   : > { %v1610_v42 = vsel %vm806_vm3, %v1605_v40, 0 }
 0x842   : > { %v2713_v26 = vpop.eup %2712 }
 0x843   : > { %v1447_v31 = vsel %vm806_vm3, %v2713_v26, 0.0 }
 0x869   : > { %v1278_v20 = vpop.f32.mrb[24].mxu1 }
 0x86a   : > { %v3312_v21 = vadd.f32 %v1325_v60, %v1278_v20  ;;  %v2508_v63 = vpop.f32.mrb[25].mxu1  ;;  %v1655_v60 = vpop.permute.xlu1 %1654 }
 0x86b   : > { %v1281_v22 = vpop.f32.mrb[26].mxu1  ;;  %v1660_v4 = vsel %vm806_vm3, %v1655_v60, 0 }
 0x86c   : > { %v3314_v23 = vadd.f32 %v1328_v0, %v1281_v22  ;;  %v2509_v5 = vpop.f32.mrb[27].mxu1 }
 0x86e   : > { %v1653_v7 = vpop.permute.xlu1 %1652 }
 0x871   : > { %v1376_v24 = vpop.f32.mrb[28].mxu1 }
 0x872   : > { %v2520_v14 = vpop.f32.mrb[29].mxu1  ;;  %v1432_v25 = vsel %vm806_vm3, %v1376_v24, -inf }
 0x873   : > { %1433 = vmax.xlane.f32.xlu0 %v1432_v25  ;;  %v1379_v27 = vpop.f32.mrb[30].mxu1 }
 0x874   : > { %v2521_v29 = vpop.f32.mrb[31].mxu1 }
 0x877   : > { %1448 = vadd.xlane.f32.xlu0 %v1447_v31 }
 0x900   : > { %v1434_v32 = vpop.xlane.xlu0 %1433 }
 0x901   : > { %v1438_v33 = vsub.f32 %v1376_v24, %v1434_v32 }
 0x903   : > { %v1440_v34 = vmul.f32 1.442695, %v1438_v33 }
 0x904   : > { %v1449_v35 = vpop.xlane.xlu0 %1448 }
 0x905   : > { %2714 = vpow2.f32 %v1440_v34 }
 0x906   : > { %2716 = vrcp.f32 %v1449_v35 }
 0x90f   : > { %v2715_v36 = vpop.eup %2714 }
 0x910   : > { %v2717_v37 = vpop.eup %2716  ;;  %v1444_v38 = vsel %vm806_vm3, %v2715_v36, 0.0 }
 0x911   : > { %v1453_v39 = vmul.f32 %v2717_v37, %v2713_v26  ;;  %1445 = vadd.xlane.f32.xlu0 %v1444_v38 }
 0x913   : > { %v1455_v41 = vpack.c.bf16 %v1453_v39, %v1453_v39 }
 0x915   : > { %2537 = vmatmul.mubr.msk.bf16.vlgmr.msra.gmra.mrb[28].mxu0 %vm806_vm3, %v1455_v41 }
 0x916   : > { %2547 = vmatpush3.bf16.xpose.msra.mxu0 %v1610_v42  ;;  %2548 = vmatprep.mubr.msk.bf16.mxu0 %vm2887_vm2, %v2886_v18 }
 0x917   : > { %2558 = vmatprep.subr.bf16.mxu0 %v2886_v18 }
 0x927   : > { %1456 = vrot.lane.b32.xlu0 %v3193_v10, %s2889_s2 }
 0x92b   : > { %1602 = vrot.lane.b32.xlu0 %v3196_v12, %s2890_s5 }
 0x99e   : > { %v1446_v43 = vpop.xlane.xlu0 %1445 }
 0x99f   : > { %2718 = vrcp.f32 %v1446_v43  ;;  %v805_v43 = vld [vmem:[%s3113_s0 + $0xc] sm:$0xf]  ;;  %s3513_s0 = scalar_lea.vmem [#allocation6], %s3082_s25 }
 0x9a0   : > { %s3514_s26 = smov %s3513_s0 }
 0x9a2   : > { %v1457_v44 = vpop.permute.xlu0 %1456 }
 0x9a3   : > { %v1462_v45 = vsel %vm926_vm4, %v1457_v44, 0  ;;  %v1827_v44 = vsel %vm926_vm4, %v805_v43, 0 }
 0x9a4   : > { %2529 = vmatpush3.bf16.msra.mxu1 %v1462_v45 }
 0x9a5   : > { %2540 = vmatprep.subr.bf16.mxu1 %v2886_v18 }
 0x9a6   : > { %v1603_v46 = vpop.permute.xlu0 %1602 }
 0x9a7   : > { %2549 = vmatmul.mubr.msk.bf16.vlgmr.msra.gmra.mrb[32].mxu0 %vm806_vm3, %v1603_v46 }
 0x9a8   : > { %2560 = vmatprep.mubr.msk.bf16.mxu0 %vm2887_vm2, %v2886_v18 }
 0x9a9   : > { %v2719_v47 = vpop.eup %2718 }
 0x9aa   : > { %v1452_v48 = vmul.f32 %v2719_v47, %v2715_v36 }
 0x9ac   : > { %v1454_v49 = vpack.c.bf16 %v1452_v48, %v1452_v48 }
 0x9ae   : > { %2531 = vmatmul.mubr.msk.bf16.vlgmr.msra.gmra.mrb[32].mxu1 %vm806_vm3, %v1454_v49 }
 0x9af   : > { %2542 = vmatprep.mubr.msk.bf16.mxu1 %vm2887_vm2, %v2886_v18  ;;  %2541 = vmatpush3.bf16.msra.mxu1 %v1557_v54 }
 0x9b0   : > { %2552 = vmatprep.subr.bf16.mxu1 %v2886_v18 }
 0x9e8   : > { %v1546_v12 = vpop.f32.mrb[28].mxu0 }
 0x9e9   : > { %v2538_v50 = vpop.f32.mrb[29].mxu0 }
 0x9ea   : > { %v1549_v51 = vpop.f32.mrb[30].mxu0 }
 0x9eb   : > { %v2539_v52 = vpop.f32.mrb[31].mxu0 }
 0xa7a   : > { %v1646_v55 = vpop.f32.mrb[32].mxu0 }
 0xa7b   : > { %v2550_v56 = vpop.f32.mrb[33].mxu0  ;;  %v1702_v57 = vsel %vm806_vm3, %v1646_v55, -inf }
 0xa7c   : > { %1703 = vmax.xlane.f32.xlu0 %v1702_v57  ;;  %v1649_v58 = vpop.f32.mrb[34].mxu0  ;;  %v1877_v56 = vrot.slane %v3160_v30, %v1876_v53 }
 0xa7d   : > { %v2551_v59 = vpop.f32.mrb[35].mxu0 }
 0xa81   : > { %v1498_v61 = vpop.f32.mrb[32].mxu1 }
 0xa82   : > { %v1552_v62 = vpack.c.bf16 %v1546_v12, %v1498_v61  ;;  %v2532_v0 = vpop.f32.mrb[33].mxu1 }
 0xa83   : > { %v1501_v1 = vpop.f32.mrb[34].mxu1 }
 0xa84   : > { %v2533_v6 = vpop.f32.mrb[35].mxu1  ;;  %2543 = vmatmul.mubr.msk.bf16.vlgmr.msra.gmra.mrb[36].mxu1 %vm806_vm3, %v1552_v62 }
 0xa85   : > { %2553 = vmatpush3.bf16.xpose.msra.mxu1 %v1660_v4  ;;  %2554 = vmatprep.mubr.msk.bf16.mxu1 %vm2887_vm2, %v2886_v18 }
 0xa86   : > { %2564 = vmatprep.subr.bf16.mxu1 %v2886_v18 }
 0xa8c   : > { %2555 = vmatmul.mubr.msk.bf16.vlgmr.msra.gmra.mrb[40].mxu1 %vm806_vm3, %v1653_v7 }
 0xa8d   : > { %2566 = vmatprep.mubr.msk.bf16.mxu1 %vm2887_vm2, %v2886_v18 }
 0xb09   : > { %v1704_v8 = vpop.xlane.xlu0 %1703 }
 0xb0a   : > { %v1708_v9 = vsub.f32 %v1646_v55, %v1704_v8 }
 0xb0c   : > { %v1710_v11 = vmul.f32 1.442695, %v1708_v9 }
 0xb0e   : > { %2720 = vpow2.f32 %v1710_v11 }
 0xb18   : > { %v2721_v15 = vpop.eup %2720 }
 0xb19   : > { %v1714_v16 = vsel %vm806_vm3, %v2721_v15, 0.0 }
 0xb1a   : > { %1715 = vadd.xlane.f32.xlu0 %v1714_v16 }
 0xb57   : > { %v1593_v17 = vpop.f32.mrb[36].mxu1 }
 0xb58   : > { %v1600_v19 = vadd.f32 %v1593_v17, %v3312_v21  ;;  %v2544_v20 = vpop.f32.mrb[37].mxu1 }
 0xb59   : > { %v1596_v63 = vpop.f32.mrb[38].mxu1  ;;  %v2686_v20 = vld [vmem:[%s3513_s0] sm:$0xff]  }
 0xb5a   : > { %v1601_v22 = vadd.f32 %v1596_v63, %v3314_v23  ;;  %v2545_v5 = vpop.f32.mrb[39].mxu1  ;;  %v2687_v63 = vld [vmem:[%s3514_s26 + $0x8] sm:$0xff]  }
 0xb5b   : > { %v2689_v5 = vld [vmem:[%s3118_s28 + $0x8] sm:$0xff]  }
 0xb5f   : > { %v1696_v24 = vpop.f32.mrb[40].mxu1 }
 0xb60   : > { %v2556_v14 = vpop.f32.mrb[41].mxu1  ;;  %v1705_v25 = vsel %vm806_vm3, %v1696_v24, -inf }
 0xb61   : > { %1706 = vmax.xlane.f32.xlu1 %v1705_v25  ;;  %v1699_v26 = vpop.f32.mrb[42].mxu1 }
 0xb62   : > { %v2557_v27 = vpop.f32.mrb[43].mxu1 }
 0xb72   : > { %1774 = vrot.lane.b32.xlu1 %v3198_v13, %s2890_s5 }
 0xba7   : > { %v1716_v35 = vpop.xlane.xlu0 %1715 }
 0xbee   : > { %v1707_v29 = vpop.xlane.xlu1 %1706 }
 0xbef   : > { %v1709_v31 = vsub.f32 %v1696_v24, %v1707_v29 }
 0xbf1   : > { %v1712_v32 = vmul.f32 1.442695, %v1709_v31  ;;  %v1908_v31 = vsub.s32 6, %v3156_v28 }
 0xbf2   : > { %v1775_v33 = vpop.permute.xlu1 %1774 }
 0xbf3   : > { %2722 = vpow2.f32 %v1712_v32  ;;  %v1780_v21 = vsel %vm926_vm4, %v1775_v33, 0  ;;  %v1909_v32 = vrot.slane %v3160_v30, %v1908_v31  ;;  %v1914_v33 = vsub.s32 7, %v3156_v28  ;;  %v2691_v28 = vld [vmem:[%s3118_s28 + $0x18] sm:$0xff]  }
 0xbf4   : > { %2565 = vmatpush3.bf16.msra.mxu1 %v1780_v21  ;;  %2724 = vrcp.f32 %v1716_v35 }
 0xbf5   : > { %2576 = vmatprep.subr.bf16.mxu1 %v2886_v18 }
 0xbfd   : > { %v2723_v23 = vpop.eup %2722 }
 0xbfe   : > { %v1717_v34 = vsel %vm806_vm3, %v2723_v23, 0.0  ;;  %v2725_v13 = vpop.eup %2724 }
 0xbff   : > { %1718 = vadd.xlane.f32.xlu0 %v1717_v34  ;;  %v1722_v37 = vmul.f32 %v2725_v13, %v2721_v15 }
 0xc01   : > { %v1724_v40 = vpack.c.bf16 %v1722_v37, %v1722_v37 }
 0xc15   : > { %1726 = vrot.lane.b32.xlu0 %v3193_v10, %s2890_s5 }
 0xc8c   : > { %v1719_v36 = vpop.xlane.xlu0 %1718 }
 0xc8d   : > { %2726 = vrcp.f32 %v1719_v36  ;;  %v1915_v36 = vrot.slane %v3160_v30, %v1914_v33 }
 0xc90   : > { %v1727_v38 = vpop.permute.xlu0 %1726 }
 0xc91   : > { %v1732_v39 = vsel %vm926_vm4, %v1727_v38, 0 }
 0xc92   : > { %2559 = vmatpush3.bf16.msra.mxu0 %v1732_v39 }
 0xc93   : > { %2570 = vmatprep.subr.bf16.mxu0 %v2886_v18 }
 0xc95   : > { %2561 = vmatmul.mubr.msk.bf16.vlgmr.msra.gmra.mrb[36].mxu0 %vm806_vm3, %v1724_v40 }
 0xc96   : > { %2572 = vmatprep.mubr.msk.bf16.mxu0 %vm2887_vm2, %v2886_v18  ;;  %2571 = vmatpush3.bf16.msra.mxu0 %v1827_v44 }
 0xc97   : > { %v2727_v10 = vpop.eup %2726  ;;  %2584 = vmatprep.subr.bf16.mxu0 %v2886_v18 }
 0xc98   : > { %v1723_v41 = vmul.f32 %v2727_v10, %v2723_v23  ;;  %v2690_v10 = vld [vmem:[%s3118_s28 + $0x10] sm:$0xff]  }
 0xc9a   : > { %v1725_v42 = vpack.c.bf16 %v1723_v41, %v1723_v41  ;;  %v2345_v41 = vld [vmem:[%s540_s11] ss:$0 sm:$0xff] }
 0xc9c   : > { %2567 = vmatmul.mubr.msk.bf16.vlgmr.msra.gmra.mrb[44].mxu1 %vm806_vm3, %v1725_v42 }
 0xc9d   : > { %2580 = vmatprep.mubr.msk.bf16.mxu1 %vm2887_vm2, %v2886_v18  ;;  %2577 = vmatpush3.bf16.msra.mxu1 %v2686_v20 }
 0xc9e   : > { %2578 = vmatprep.subr.bf16.mxu1 %v2886_v18 }
 0xca1   : > { %2579 = vmatpush3.bf16.msra.mxu1 %v2687_v63  ;;  %v2357_v63 = vld [vmem:[%s3515_s20 + $0x1] ss:$0 sm:$0xff] (!%p2355_p1) }
 0xd68   : > { %v1768_v45 = vpop.f32.mrb[36].mxu0 }
 0xd69   : > { %v2562_v46 = vpop.f32.mrb[37].mxu0 }
 0xd6a   : > { %v1771_v47 = vpop.f32.mrb[38].mxu0 }
 0xd6b   : > { %v2563_v48 = vpop.f32.mrb[39].mxu0 }
 0xd6f   : > { %v1816_v49 = vpop.f32.mrb[44].mxu1 }
 0xd70   : > { %v1822_v12 = vpack.c.bf16 %v1816_v49, %v1768_v45  ;;  %v2568_v50 = vpop.f32.mrb[45].mxu1 }
 0xd71   : > { %v1819_v51 = vpop.f32.mrb[46].mxu1 }
 0xd72   : > { %v2569_v52 = vpop.f32.mrb[47].mxu1  ;;  %2573 = vmatmul.mubr.msk.bf16.vlgmr.msra.gmra.mrb[40].mxu0 %vm806_vm3, %v1822_v12  ;;  %v2349_v12 = vld [vmem:[%s3123_s9 + $0x8] ss:$0 sm:$0xff] }
 0xd73   : > { %2592 = vmatprep.mubr.msk.bf16.mxu0 %vm2887_vm2, %v2886_v18 }
 0xe45   : > { %v1863_v54 = vpop.f32.mrb[40].mxu0 }
 0xe46   : > { %v1870_v55 = vadd.f32 %v1863_v54, %v1600_v19  ;;  %v2574_v57 = vpop.f32.mrb[41].mxu0 }
 0xe47   : > { %v1866_v58 = vpop.f32.mrb[42].mxu0 }
 0xe48   : > { %v1872_v59 = vadd.f32 %v1870_v55, %v3130_v2  ;;  %v1871_v60 = vadd.f32 %v1866_v58, %v1601_v22  ;;  %v2575_v61 = vpop.f32.mrb[43].mxu0  ;;  %v2688_v22 = vld [vmem:[%s3118_s28] sm:$0xff]  }
 0xe49   : > { %2585 = vmatpush3.bf16.msra.mxu0 %v2688_v22 }
 0xe4a   : > { %v3376_v62 = vadd.f32 %v1877_v56, %v1872_v59  ;;  %v1873_v0 = vadd.f32 %v1871_v60, %v3132_v3  ;;  %2586 = vmatprep.subr.bf16.mxu0 %v2886_v18 }
 0xe4c   : > { %v3379_v1 = vadd.f32 %v1877_v56, %v1873_v0  ;;  %v1880_v4 = vsel %vm557_vm1, %v3376_v62, 0.0 }
 0xe4d   : > { %1881 = vadd.xlane.f32.xlu1 %v1880_v4  ;;  %2587 = vmatpush3.bf16.msra.mxu0 %v2689_v5 }
 0xe4e   : > { %v1883_v6 = vsel %vm557_vm1, %v3379_v1, 0.0  ;;  %2588 = vmatprep.subr.bf16.mxu0 %v2886_v18 }
 0xe4f   : > { %1884 = vadd.xlane.f32.xlu0 %v1883_v6 }
 0xe51   : > { %2589 = vmatpush3.bf16.msra.mxu0 %v2690_v10 }
 0xe52   : > { %2590 = vmatprep.subr.bf16.mxu0 %v2886_v18 }
 0xe55   : > { %2591 = vmatpush3.bf16.msra.mxu0 %v2691_v28 }
 0xeda   : > { %v1882_v7 = vpop.xlane.xlu1 %1881 }
 0xedb   : > { %v1886_v2 = vmul.f32 0.03125, %v1882_v7 }
 0xedc   : > { %v1885_v8 = vpop.xlane.xlu0 %1884 }
 0xedd   : > { %v1888_v9 = vsub.f32 %v3376_v62, %v1886_v2  ;;  %v1887_v3 = vmul.f32 0.03125, %v1885_v8 }
 0xedf   : > { %v1889_v11 = vsub.f32 %v3379_v1, %v1887_v3  ;;  %v1890_v15 = vmul.f32 %v1888_v9, %v1888_v9 }
 0xee1   : > { %v1892_v16 = vsel %vm557_vm1, %v1890_v15, 0.0  ;;  %v1891_v17 = vmul.f32 %v1889_v11, %v1889_v11 }
 0xee2   : > { %1893 = vadd.xlane.f32.xlu0 %v1892_v16 }
 0xee3   : > { %v1895_v19 = vsel %vm557_vm1, %v1891_v17, 0.0 }
 0xee4   : > { %1896 = vadd.xlane.f32.xlu1 %v1895_v19  ;;  %v2356_v19 = vld [vmem:[%s3515_s20] ss:$0 sm:$0xff] (!%p2355_p1) }
 0xf6f   : > { %v1894_v24 = vpop.xlane.xlu0 %1893 }
 0xf70   : > { %v1898_v14 = vmul.f32 0.03125, %v1894_v24 }
 0xf71   : > { %v1897_v25 = vpop.xlane.xlu1 %1896 }
 0xf72   : > { %v1900_v26 = vadd.f32 1e-05, %v1898_v14  ;;  %v1899_v27 = vmul.f32 0.03125, %v1897_v25 }
 0xf74   : > { %2728 = vrsqrt.f32 %v1900_v26  ;;  %v1901_v29 = vadd.f32 1e-05, %v1899_v27 }
 0xf76   : > { %2730 = vrsqrt.f32 %v1901_v29 }
 0xf7e   : > { %v2729_v21 = vpop.eup %2728 }
 0xf7f   : > { %v1904_v23 = vmul.f32 %v2729_v21, %v1888_v9 }
 0xf80   : > { %v2731_v34 = vpop.eup %2730 }
 0xf81   : > { %v1910_v35 = vmul.f32 %v1909_v32, %v1904_v23  ;;  %v1905_v13 = vmul.f32 %v2731_v34, %v1889_v11 }
 0xf83   : > { %v1911_v37 = vmul.f32 %v1909_v32, %v1905_v13  ;;  %v1916_v38 = vadd.f32 %v1915_v36, %v1910_v35 }
 0xf85   : > { %v1917_v39 = vadd.f32 %v1915_v36, %v1911_v37 }
 0xf87   : > { %v1918_v40 = vpack.c.bf16 %v1917_v39, %v1916_v38 }
 0xf89   : > { %2581 = vmatmul.mubr.msk.bf16.vlgmr.msra.gmra.mrb[48].mxu1 %vm557_vm1, %v1918_v40 }
0x105c   : > { %v1978_v42 = vpop.f32.mrb[48].mxu1 }
0x105d   : > { %v1979_v30 = vadd.f32 %v2345_v41, %v1978_v42  ;;  %v2582_v43 = vpop.f32.mrb[49].mxu1 }
0x105e   : > { %v1981_v44 = vpop.f32.mrb[50].mxu1 }
0x105f   : > { %v1982_v45 = vadd.f32 %v2345_v41, %v1981_v44  ;;  %v2583_v46 = vpop.f32.mrb[51].mxu1  ;;  %v1985_v47 = vmax.f32 %v1979_v30, 0.0 }
0x1061   : > { %v1986_v48 = vmax.f32 %v1982_v45, 0.0 }
0x1063   : > { %v1987_v49 = vpack.c.bf16 %v1986_v48, %v1985_v47 }
0x1065   : > { %2593 = vmatmul.mubr.msk.bf16.vlgmr.msra.gmra.mrb[44].mxu0 %vm2024_vm5, %v1987_v49 }
0x1138   : > { %v2062_v18 = vpop.f32.mrb[44].mxu0 }
0x1139   : > { %v2063_v50 = vadd.f32 %v2349_v12, %v2062_v18  ;;  %v2594_v51 = vpop.f32.mrb[45].mxu0  ;;  %2076 = sbr.rel (%p2355_p1) target bundleno = 4731 (0x127b), region = 76 }
0x113a   : > { %v2065_v52 = vpop.f32.mrb[46].mxu0 }
0x113b   : > { %v2069_v53 = vadd.f32 %v2063_v50, %v3376_v62  ;;  %v2066_v54 = vadd.f32 %v2349_v12, %v2065_v52  ;;  %v2595_v55 = vpop.f32.mrb[47].mxu0 }
0x113d   : > { %2071 = vst.msk [vmem:[#allocation2] sm:$0xff] %vm557_vm1, %v2069_v53  ;;  %v2070_v56 = vadd.f32 %v2066_v54, %v3379_v1  ;;  %v2079_v57 = vsel (!%p2355_p1), %vm557_vm1, %v2069_v53, 0.0 }
0x113e   : > { %2080 = vadd.xlane.f32.xlu0 (!%p2355_p1), %v2079_v57 }
0x113f   : > { %2072 = vst.msk [vmem:[#allocation2 + $0x8] sm:$0xff] %vm557_vm1, %v2070_v56  ;;  %v2082_v58 = vsel (!%p2355_p1), %vm557_vm1, %v2070_v56, 0.0 }
0x1142   : > { %2083 = vadd.xlane.f32.xlu0 %v2082_v58 }
0x11cb   : > { %v2081_v59 = vpop.xlane.xlu0 %2080 }
0x11cc   : > { %v2085_v60 = vmul.f32 0.03125, %v2081_v59 }
0x11ce   : > { %v2087_v61 = vsub.f32 %v2069_v53, %v2085_v60 }
0x11cf   : > { %v2084_v62 = vpop.xlane.xlu0 %2083 }
0x11d0   : > { %v2086_v0 = vmul.f32 0.03125, %v2084_v62  ;;  %v2089_v4 = vmul.f32 %v2087_v61, %v2087_v61 }
0x11d2   : > { %v2088_v6 = vsub.f32 %v2070_v56, %v2086_v0  ;;  %v2091_v1 = vsel %vm557_vm1, %v2089_v4, 0.0 }
0x11d3   : > { %2092 = vadd.xlane.f32.xlu1 %v2091_v1 }
0x11d4   : > { %v2090_v7 = vmul.f32 %v2088_v6, %v2088_v6 }
0x11d6   : > { %v2094_v2 = vsel %vm557_vm1, %v2090_v7, 0.0 }
0x11d7   : > { %2095 = vadd.xlane.f32.xlu1 %v2094_v2 }
0x1260   : > { %v2093_v8 = vpop.xlane.xlu1 %2092 }
0x1261   : > { %v2097_v9 = vmul.f32 0.03125, %v2093_v8 }
0x1263   : > { %v2099_v3 = vadd.f32 1e-05, %v2097_v9 }
0x1264   : > { %v2096_v11 = vpop.xlane.xlu1 %2095 }
0x1265   : > { %2732 = vrsqrt.f32 %v2099_v3  ;;  %v2098_v15 = vmul.f32 0.03125, %v2096_v11 }
0x1267   : > { %v2100_v16 = vadd.f32 1e-05, %v2098_v15 }
0x1269   : > { %2734 = vrsqrt.f32 %v2100_v16 }
0x126f   : > { %v2733_v17 = vpop.eup %2732 }
0x1270   : > { %v2103_v20 = vmul.f32 %v2733_v17, %v2087_v61 }
0x1272   : > { %v2109_v22 = vmul.f32 %v2356_v19, %v2103_v20 }
0x1273   : > { %v2735_v5 = vpop.eup %2734 }
0x1274   : > { %v2115_v24 = vadd.f32 %v2357_v63, %v2109_v22  ;;  %v2104_v14 = vmul.f32 %v2735_v5, %v2088_v6 }
0x1276   : > { %2117 = vst.msk [vmem:[#allocation8] sm:$0xff] %vm557_vm1, %v2115_v24  ;;  %v2110_v25 = vmul.f32 %v2356_v19, %v2104_v14 }
0x1278   : > { %v2116_v26 = vadd.f32 %v2357_v63, %v2110_v25 }
0x127a   : > { %2118 = vst.msk [vmem:[#allocation8 + $0x8] sm:$0xff] %vm557_vm1, %v2116_v26 }
0x127b PF: > { %s3516_s21 = sadd.s32 4294967295, %s2878_s18   ;;  %s2891_s23 = smov [#allocation8]  }
0x127c   : > { %p3431_p5 = scmp.eq.s32.totalorder %s3516_s21, 1  ;;  %s2128_s13 = sshll.u32 %s2891_s23, 4  ;;  %s2129_s13 = int_to_ptr.vmem [resolvable:$true] %s2128_s13 }
0x127d   : > { %s2794_s28 = scalar_lea.vmem %s2129_s13, 256  ;;  %p2801_p11 = scmp.lt.s32.totalorder %s2129_s13, %s2129_s13 }
0x127e   : > { %p2795_p8 = scmp.ne.s32.totalorder %s2129_s13, %s2794_s28  ;;  %p2802_p13 = scmp.lt.s32.totalorder %s2794_s28, %s2794_s28 }
0x1280   : > { %p2796_p9 = pnand %p2795_p8, %p3431_p5  ;;  %p2803_p2 = por %p2802_p13, %p2801_p11 }
0x1282   : > { %p2797_p10 = pneg %p2796_p9 }
0x1284   : > { %p2804_p3 = pnand %p2803_p2, %p2797_p10 }
0x1286   : > { %2807 = shalt.err (!%p2804_p3)
}
0x1287   : > { %s3518_s19 = sld [smem:[#allocation18_spill]] }
0x128d   : > { %s2808_s11 = scalar_lea.hbm %s3518_s19, 256 }
0x128e   : > { %p2809_p12 = scmp.ne.s32.totalorder %s3518_s19, %s2808_s11  ;;  %p2814_p7 = scmp.lt.u32.totalorder %s2808_s11, %s3518_s19 }
0x1290   : > { %p2810_p0 = pnand %p2809_p12, %p3431_p5 }
0x1292   : > { %p2811_p6 = pneg %p2810_p0 }
0x1294   : > { %p2816_p4 = pnand %p2814_p7, %p2811_p6 }
0x1296   : > { %2819 = shalt.err (!%p2816_p4)
}
0x1297   : > { %s2892_s26 = smov 128   ;;  %s2893_s25 = smov 8  }
0x1298   : > { %2603 = dma.vmem_to_hbm [thread:$0]  (%p3431_p5), %s2129_s13, 256, %s3518_s19, [#allocation5], %s2892_s26, %s2892_s26, %s2893_s25  }
0x1299   : > { %2853 = dma.done.wait (%p3431_p5), [#allocation5], 256  }
0x129a   : > { %2855 = vsyncadd (%p3431_p5), [#allocation5], 4294967040 }
0x129b PF: > { %s25_s18 = sadd.s32 1, %s2878_s18   ;;  %s3519_s22 = sld [smem:[#allocation12_spill]] }
0x129c   : > { %p22_p1 = scmp.ge.s32.totalorder %s25_s18, 4   ;;  %s3520_s13 = smov %s2862_s14 }
0x129d   : > { %s3521_s14 = smov %s2866_s15  ;;  %s3522_s15 = smov %s3034_s10 }
0x129e   : > { %s3523_s16 = smov %s2874_s17  ;;  %24 = sbr.rel (!%p22_p1) target bundleno = 13 (0xd), region = 133 }
0x12a1   : > { %s3524_s17 = smov %s3519_s22 }
0x12a5   :  { %2144 = vsyncpa [#allocation4], 1 }
0x12a6   :  { %2146 = vsyncpa [#allocation4 + $0x1], 1 }
0x12a7   :  { %2147 = vsyncpa [#allocation7], 1 }
0x12a8   :  { %2149 = vsyncpa [#allocation7 + $0x1], 1 }
0x12a9   :  { %2150 = vsyncpa [#allocation5], 1 }
0x12aa   :  { %2152 = vsyncpa [#allocation5 + $0x1], 1 }

</bundles_post_ra>
